<compile_context>
chip_gen: v6e
topology: v6e:2x2x1
jax: 0.10.0
libtpu: 0.0.40
codegen_flags: <defaults>
</compile_context>

<pallas_src>
import functools

import jax
import jax.numpy as jnp
import numpy as np
from jax.experimental import pallas as pl
from jax.experimental.pallas import tpu as pltpu

EPS = 1e-5


def memory_block_kernel(
    x_ref,      # (C, M)            input activation, channel-major
    lm_ref,     # (P*C, M)          long memory, channel-concatenated
    rg_ref,     # (C, 2R)           BN gamma of residual BNReLUConvs
    rbt_ref,    # (C, 2R)           BN beta
    rw_ref,     # (2R, C, 9C)       3x3 conv weights, taps packed on lanes
    rb_ref,     # (C, 2R)           conv biases
    gg_ref,     # ((P+R)*C, 1)      gate BN gamma
    gbt_ref,    # ((P+R)*C, 1)      gate BN beta
    gw_ref,     # (C, (P+R)*C)      gate 1x1 conv weight (Cout, Cin_total)
    gb_ref,     # (C, 1)            gate conv bias
    masks_ref,  # (4, M) f32        [h>0, h<H-1, w>0, w<W-1] per column
    out_ref,    # (C, M)            gate output
    *, W,
):
    C, M = x_ref.shape
    R = rg_ref.shape[1] // 2
    PC = lm_ref.shape[0]            # P * C
    inv_m = 1.0 / M

    # Boundary masks, broadcast once and reused by every conv (hoisted so the
    # non-CSE'd broadcast_in_dim is emitted 4 times total, not per tap).
    h_top = jnp.broadcast_to(masks_ref[0:1, :], (C, M))       # (h-1) exists
    h_bot = jnp.broadcast_to(masks_ref[1:2, :], (C, M))       # (h+1) exists
    w_lft = jnp.broadcast_to(masks_ref[2:3, :], (3 * C, M))   # (w-1) exists
    w_rgt = jnp.broadcast_to(masks_ref[3:4, :], (3 * C, M))   # (w+1) exists

    def bn_relu(a, gamma, beta):
        # a: (Cc, M); gamma/beta: (Cc, 1). Training-mode BN (per-channel
        # biased batch stats over all of N,H,W) + ReLU.  Sum and sum-of-
        # squares share a single cross-lane reduction on a (2Cc, M) stack.
        cc = a.shape[0]
        ss = jnp.sum(jnp.concatenate([a, a * a], axis=0), axis=1, keepdims=True)
        mean = ss[:cc] * inv_m
        var = jnp.maximum(ss[cc:] * inv_m - mean * mean, 0.0)
        y = (a - mean) * (jax.lax.rsqrt(var + EPS) * gamma) + beta
        return jnp.maximum(y, 0.0)

    def conv3x3(a, idx):
        # Zero-padded 3x3 conv as ONE (C, 9C) x (9C, M) matmul.  The nine taps
        # are built with 4 lane rolls: two dy rolls on (C, M) (h boundary
        # masked), then two dx rolls on the stacked (3C, M) block (w boundary
        # masked).  Any roll wrap-around lands on a masked boundary column, so
        # no explicit padding buffer exists.  Row order = kx*3C + ky*C + cin,
        # matching the wrapper-side weight packing.
        up = pltpu.roll(a, W, axis=1) * h_top            # dy = -1
        down = pltpu.roll(a, M - W, axis=1) * h_bot      # dy = +1
        mid3 = jnp.concatenate([up, a, down], axis=0)    # (3C, M), ky = 0,1,2
        left = pltpu.roll(mid3, 1, axis=1) * w_lft       # dx = -1
        right = pltpu.roll(mid3, M - 1, axis=1) * w_rgt  # dx = +1
        taps = jnp.concatenate([left, mid3, right], axis=0)   # (9C, M)
        return (jnp.dot(rw_ref[idx], taps, preferred_element_type=jnp.float32)
                + rb_ref[:, idx:idx + 1])

    # ---- gate: long-memory contribution (all P chunks fused) ---------------
    a_lm = bn_relu(lm_ref[...].astype(jnp.float32),
                   gg_ref[:PC, :], gbt_ref[:PC, :])
    gate = (jnp.dot(gw_ref[:, :PC], a_lm, preferred_element_type=jnp.float32)
            + gb_ref[...])                               # f32 accumulator

    # ---- residual chain (short memory); each block output feeds the gate ---
    cur = x_ref[...].astype(jnp.float32)
    for r in range(R):
        res = cur
        t = bn_relu(cur, rg_ref[:, 2 * r:2 * r + 1], rbt_ref[:, 2 * r:2 * r + 1])
        t = conv3x3(t, 2 * r)
        t = bn_relu(t, rg_ref[:, 2 * r + 1:2 * r + 2],
                    rbt_ref[:, 2 * r + 1:2 * r + 2])
        t = conv3x3(t, 2 * r + 1)
        cur = t + res

        off = PC + r * C
        a = bn_relu(cur, gg_ref[off:off + C, :], gbt_ref[off:off + C, :])
        gate = gate + jnp.dot(gw_ref[:, off:off + C], a,
                              preferred_element_type=jnp.float32)

    # Single lane-dense store of the final result.
    out_ref[...] = gate.astype(out_ref.dtype)


def memory_block_forward(x_nchw, long_mem_nchw, kparams):
    """x_nchw: (N,C,H,W); long_mem_nchw: list of P arrays (N,C,H,W)."""
    rg, rbt, rw, rb, gg, gbt, gw, gb = kparams
    N, C, H, W = x_nchw.shape
    M = N * H * W

    x_cm = jnp.transpose(x_nchw, (1, 0, 2, 3)).reshape(C, M)          # (C, M)
    lm = jnp.stack(long_mem_nchw, axis=0)                             # (P,N,C,H,W)
    lm_cm = jnp.transpose(lm, (0, 2, 1, 3, 4)).reshape(-1, M)         # (P*C, M)
    # TODO(synk): accept long_mem pre-stacked channel-major to drop this
    # transpose from the hot path entirely.

    # Boundary masks as host-side constants (no runtime XLA ops).
    flat = np.arange(M)
    hh = (flat // W) % H
    ww = flat % W
    masks = jnp.asarray(np.stack(
        [hh > 0, hh < H - 1, ww > 0, ww < W - 1], axis=0).astype(np.float32))

    full = lambda s: pl.BlockSpec(s, lambda i, _n=len(s): (0,) * _n)
    kernel = functools.partial(memory_block_kernel, W=W)

    out_cm = pl.pallas_call(
        kernel,
        out_shape=jax.ShapeDtypeStruct((C, M), x_nchw.dtype),
        grid=(1,),
        in_specs=[
            full(x_cm.shape), full(lm_cm.shape),
            full(rg.shape), full(rbt.shape), full(rw.shape), full(rb.shape),
            full(gg.shape), full(gbt.shape), full(gw.shape), full(gb.shape),
            full(masks.shape),
        ],
        out_specs=full((C, M)),
        compiler_params=pltpu.CompilerParams(
            dimension_semantics=("arbitrary",)),
    )(x_cm, lm_cm, rg, rbt, rw, rb, gg, gbt, gw, gb, masks)
    # TODO(synk): for large N*H*W, tile M across a "parallel" grid (dual-TC use
    # on v7x + DMA pipelining, and to respect its 64 MiB VMEM).  That requires
    # a two-pass / cross-tile BN-statistics scheme between every stage, so the
    # tested small shape stays a single grid step (~hundreds of KiB in VMEM).

    return jnp.transpose(out_cm.reshape(C, N, H, W), (1, 0, 2, 3))     # NCHW


# ----------------------- pure-JAX reference (for checking) -----------------------
def reference_forward(x_nchw, long_mem_nchw, raw):
    rg, rbt, rw_oihw, rb, gg, gbt, gw_oi, gb = raw
    N, C, H, W = x_nchw.shape
    P = len(long_mem_nchw)
    R = rg.shape[0] // 2
    x = jnp.transpose(x_nchw, (0, 2, 3, 1))
    lm = jnp.concatenate([jnp.transpose(t, (0, 2, 3, 1)) for t in long_mem_nchw], -1)

    def bnrelu(a, gamma, beta):
        mean = jnp.mean(a, axis=(0, 1, 2), keepdims=True)
        var = jnp.mean(jnp.square(a - mean), axis=(0, 1, 2), keepdims=True)
        return jnp.maximum((a - mean) * jax.lax.rsqrt(var + EPS) * gamma + beta, 0.0)

    def conv3x3(a, idx):
        ap = jnp.pad(a, ((0, 0), (1, 1), (1, 1), (0, 0)))
        o = jnp.zeros((N, H, W, C), jnp.float32)
        for ky in range(3):
            for kx in range(3):
                o = o + jnp.einsum('nhwc,dc->nhwd',
                                   ap[:, ky:ky + H, kx:kx + W, :],
                                   rw_oihw[idx, :, :, ky, kx])
        return o + rb[idx].reshape(1, 1, 1, C)

    cur = x
    gate = jnp.zeros((N, H, W, C), jnp.float32)
    for p in range(P):
        a = bnrelu(lm[..., p * C:(p + 1) * C],
                   gg[p * C:(p + 1) * C].reshape(1, 1, 1, C),
                   gbt[p * C:(p + 1) * C].reshape(1, 1, 1, C))
        gate = gate + jnp.einsum('nhwc,dc->nhwd', a, gw_oi[:, p * C:(p + 1) * C])
    for r in range(R):
        res = cur
        h = bnrelu(cur, rg[2 * r].reshape(1, 1, 1, C), rbt[2 * r].reshape(1, 1, 1, C))
        h = conv3x3(h, 2 * r)
        h = bnrelu(h, rg[2 * r + 1].reshape(1, 1, 1, C),
                   rbt[2 * r + 1].reshape(1, 1, 1, C))
        h = conv3x3(h, 2 * r + 1)
        cur = h + res
        off = (P + r) * C
        a = bnrelu(cur, gg[off:off + C].reshape(1, 1, 1, C),
                   gbt[off:off + C].reshape(1, 1, 1, C))
        gate = gate + jnp.einsum('nhwc,dc->nhwd', a, gw_oi[:, off:off + C])
    gate = gate + gb.reshape(1, 1, 1, C)
    return jnp.transpose(gate, (0, 3, 1, 2))


if __name__ == "__main__":
    # Small shapes: N=2, C=4, H=W=16, num_resblock R=2, num_prememblock P=2.
    N, C, H, W, R, P = 2, 4, 16, 16, 2, 2

    key = jax.random.PRNGKey(0)
    ks = jax.random.split(key, 12)

    # PyTorch-shaped synthetic parameters.
    rg_raw = 1.0 + 0.1 * jax.random.normal(ks[0], (2 * R, C), jnp.float32)      # BN gamma
    rbt_raw = 0.1 * jax.random.normal(ks[1], (2 * R, C), jnp.float32)           # BN beta
    rw_oihw = 0.2 * jax.random.normal(ks[2], (2 * R, C, C, 3, 3), jnp.float32)  # Conv2d OIHW
    rb_raw = 0.05 * jax.random.normal(ks[3], (2 * R, C), jnp.float32)
    gg_raw = 1.0 + 0.1 * jax.random.normal(ks[4], ((R + P) * C,), jnp.float32)
    gbt_raw = 0.1 * jax.random.normal(ks[5], ((R + P) * C,), jnp.float32)
    gw_oi = 0.2 * jax.random.normal(ks[6], (C, (R + P) * C), jnp.float32)       # 1x1 conv (O,I)
    gb_raw = 0.05 * jax.random.normal(ks[7], (C,), jnp.float32)
    raw = (rg_raw, rbt_raw, rw_oihw, rb_raw, gg_raw, gbt_raw, gw_oi, gb_raw)

    # Kernel-layout parameters (channel-major, lane-dense conv weights).
    # rw packing: (2R, O, I, KH, KW) -> (2R, O, KW, KH, I) -> (2R, C, 9C)
    # so column index = kx*3C + ky*C + cin, matching the in-kernel tap stack.
    kparams = (
        rg_raw.T,                                                           # (C, 2R)
        rbt_raw.T,                                                          # (C, 2R)
        jnp.transpose(rw_oihw, (0, 1, 4, 3, 2)).reshape(2 * R, C, 9 * C),   # (2R, C, 9C)
        rb_raw.T,                                                           # (C, 2R)
        gg_raw.reshape(-1, 1),                                              # ((P+R)*C, 1)
        gbt_raw.reshape(-1, 1),
        gw_oi,                                                              # (C, (P+R)*C)
        gb_raw.reshape(C, 1),
    )

    # Inputs (PyTorch NCHW convention).
    x = jax.random.normal(ks[8], (N, C, H, W), jnp.float32)
    long_mem = [jax.random.normal(ks[9], (N, C, H, W), jnp.float32),
                jax.random.normal(ks[10], (N, C, H, W), jnp.float32)]

    fwd = jax.jit(memory_block_forward)
    out = jax.block_until_ready(fwd(x, long_mem, kparams))
    ref = jax.block_until_ready(reference_forward(x, long_mem, raw))
    np.testing.assert_allclose(np.asarray(out), np.asarray(ref), rtol=1e-3, atol=1e-3)

    print("KERNEL_OK")
</pallas_src>

<mosaic_0001>
module attributes {stable_mosaic.version = 11 : i64} {
  func.func @memory_block_kernel(%arg0: i32, %arg1: memref<4x512xf32, #tpu.memory_space<vmem>>, %arg2: memref<8x512xf32, #tpu.memory_space<vmem>>, %arg3: memref<4x4xf32, #tpu.memory_space<vmem>>, %arg4: memref<4x4xf32, #tpu.memory_space<vmem>>, %arg5: memref<4x4x36xf32, #tpu.memory_space<vmem>>, %arg6: memref<4x4xf32, #tpu.memory_space<vmem>>, %arg7: memref<16x1xf32, #tpu.memory_space<vmem>>, %arg8: memref<16x1xf32, #tpu.memory_space<vmem>>, %arg9: memref<4x16xf32, #tpu.memory_space<vmem>>, %arg10: memref<4x1xf32, #tpu.memory_space<vmem>>, %arg11: memref<4x512xf32, #tpu.memory_space<vmem>>, %arg12: memref<4x512xf32, #tpu.memory_space<vmem>>) attributes {dimension_semantics = [#tpu.dimension_semantics<arbitrary>], iteration_bounds = array<i64: 1>, scalar_prefetch = 0 : i64, scratch_operands = 0 : i64, tpu.core_type = #tpu.core_type<tc>, window_params = [{pipeline_mode = #tpu.pipeline_mode<synchronous>, transform_indices = @transform_0, window_bounds = array<i64: 4, 512>}, {pipeline_mode = #tpu.pipeline_mode<synchronous>, transform_indices = @transform_1, window_bounds = array<i64: 8, 512>}, {pipeline_mode = #tpu.pipeline_mode<synchronous>, transform_indices = @transform_2, window_bounds = array<i64: 4, 4>}, {pipeline_mode = #tpu.pipeline_mode<synchronous>, transform_indices = @transform_3, window_bounds = array<i64: 4, 4>}, {pipeline_mode = #tpu.pipeline_mode<synchronous>, transform_indices = @transform_4, window_bounds = array<i64: 4, 4, 36>}, {pipeline_mode = #tpu.pipeline_mode<synchronous>, transform_indices = @transform_5, window_bounds = array<i64: 4, 4>}, {pipeline_mode = #tpu.pipeline_mode<synchronous>, transform_indices = @transform_6, window_bounds = array<i64: 16, 1>}, {pipeline_mode = #tpu.pipeline_mode<synchronous>, transform_indices = @transform_7, window_bounds = array<i64: 16, 1>}, {pipeline_mode = #tpu.pipeline_mode<synchronous>, transform_indices = @transform_8, window_bounds = array<i64: 4, 16>}, {pipeline_mode = #tpu.pipeline_mode<synchronous>, transform_indices = @transform_9, window_bounds = array<i64: 4, 1>}, {pipeline_mode = #tpu.pipeline_mode<synchronous>, transform_indices = @transform_10, window_bounds = array<i64: 4, 512>}, {pipeline_mode = #tpu.pipeline_mode<synchronous>, transform_indices = @transform_11, window_bounds = array<i64: 4, 512>}]} {
    %c0 = arith.constant 0 : index
    %c0_0 = arith.constant 0 : index
    %0 = vector.load %arg11[%c0, %c0_0] : memref<4x512xf32, #tpu.memory_space<vmem>>, vector<1x512xf32>
    %1 = vector.shape_cast %0 : vector<1x512xf32> to vector<1x512xf32>
    %2 = vector.broadcast %1 : vector<1x512xf32> to vector<4x512xf32>
    %c1 = arith.constant 1 : index
    %c0_1 = arith.constant 0 : index
    %3 = vector.load %arg11[%c1, %c0_1] : memref<4x512xf32, #tpu.memory_space<vmem>>, vector<1x512xf32>
    %4 = vector.shape_cast %3 : vector<1x512xf32> to vector<1x512xf32>
    %5 = vector.broadcast %4 : vector<1x512xf32> to vector<4x512xf32>
    %c2 = arith.constant 2 : index
    %c0_2 = arith.constant 0 : index
    %6 = vector.load %arg11[%c2, %c0_2] : memref<4x512xf32, #tpu.memory_space<vmem>>, vector<1x512xf32>
    %7 = vector.shape_cast %6 : vector<1x512xf32> to vector<1x512xf32>
    %8 = vector.broadcast %7 : vector<1x512xf32> to vector<12x512xf32>
    %c3 = arith.constant 3 : index
    %c0_3 = arith.constant 0 : index
    %9 = vector.load %arg11[%c3, %c0_3] : memref<4x512xf32, #tpu.memory_space<vmem>>, vector<1x512xf32>
    %10 = vector.shape_cast %9 : vector<1x512xf32> to vector<1x512xf32>
    %11 = vector.broadcast %10 : vector<1x512xf32> to vector<12x512xf32>
    %c0_4 = arith.constant 0 : index
    %c0_5 = arith.constant 0 : index
    %12 = vector.load %arg2[%c0_4, %c0_5] : memref<8x512xf32, #tpu.memory_space<vmem>>, vector<8x512xf32>
    %c0_6 = arith.constant 0 : index
    %c0_7 = arith.constant 0 : index
    %13 = vector.load %arg7[%c0_6, %c0_7] : memref<16x1xf32, #tpu.memory_space<vmem>>, vector<8x1xf32>
    %c0_8 = arith.constant 0 : index
    %c0_9 = arith.constant 0 : index
    %14 = vector.load %arg8[%c0_8, %c0_9] : memref<16x1xf32, #tpu.memory_space<vmem>>, vector<8x1xf32>
    %15 = arith.mulf %12, %12 : vector<8x512xf32>
    %16 = tpu.concatenate %12, %15 in 0 : vector<8x512xf32>, vector<8x512xf32> -> vector<16x512xf32>
    %cst = arith.constant dense<0.000000e+00> : vector<16xf32>
    %17 = vector.multi_reduction <add>, %16, %cst [1] : vector<16x512xf32> to vector<16xf32>
    %18 = vector.shape_cast %17 : vector<16xf32> to vector<16x1xf32>
    %19 = vector.extract_strided_slice %18 {offsets = [0, 0], sizes = [8, 1], strides = [1, 1]} : vector<16x1xf32> to vector<8x1xf32>
    %cst_10 = arith.constant 0.001953125 : f32
    %20 = vector.broadcast %cst_10 : f32 to vector<8x1xf32>
    %21 = arith.mulf %19, %20 : vector<8x1xf32>
    %22 = vector.extract_strided_slice %18 {offsets = [8, 0], sizes = [8, 1], strides = [1, 1]} : vector<16x1xf32> to vector<8x1xf32>
    %cst_11 = arith.constant 0.001953125 : f32
    %23 = vector.broadcast %cst_11 : f32 to vector<8x1xf32>
    %24 = arith.mulf %22, %23 : vector<8x1xf32>
    %25 = arith.mulf %21, %21 : vector<8x1xf32>
    %26 = arith.subf %24, %25 : vector<8x1xf32>
    %cst_12 = arith.constant 0.000000e+00 : f32
    %27 = vector.broadcast %cst_12 : f32 to vector<8x1xf32>
    %28 = arith.maximumf %26, %27 : vector<8x1xf32>
    %29 = vector.broadcast %21 : vector<8x1xf32> to vector<8x512xf32>
    %30 = arith.subf %12, %29 : vector<8x512xf32>
    %cst_13 = arith.constant 9.99999974E-6 : f32
    %31 = vector.broadcast %cst_13 : f32 to vector<8x1xf32>
    %32 = arith.addf %28, %31 : vector<8x1xf32>
    %33 = math.rsqrt %32 : vector<8x1xf32>
    %34 = arith.mulf %33, %13 : vector<8x1xf32>
    %35 = vector.broadcast %34 : vector<8x1xf32> to vector<8x512xf32>
    %36 = arith.mulf %30, %35 : vector<8x512xf32>
    %37 = vector.broadcast %14 : vector<8x1xf32> to vector<8x512xf32>
    %38 = arith.addf %36, %37 : vector<8x512xf32>
    %cst_14 = arith.constant 0.000000e+00 : f32
    %39 = vector.broadcast %cst_14 : f32 to vector<8x512xf32>
    %40 = arith.maximumf %38, %39 : vector<8x512xf32>
    %c0_15 = arith.constant 0 : index
    %c0_16 = arith.constant 0 : index
    %41 = vector.load %arg9[%c0_15, %c0_16] : memref<4x16xf32, #tpu.memory_space<vmem>>, vector<4x8xf32>
    %cst_17 = arith.constant dense<0.000000e+00> : vector<4x512xf32>
    %42 = tpu.matmul %41, %40, %cst_17 {dimension_numbers = #tpu.dot_dimension_numbers<[1], [0], [0], [1], [0, 0, 1, 1], [], []>} : vector<4x8xf32>, vector<8x512xf32>, vector<4x512xf32> -> vector<4x512xf32>
    %c0_18 = arith.constant 0 : index
    %c0_19 = arith.constant 0 : index
    %43 = vector.load %arg10[%c0_18, %c0_19] : memref<4x1xf32, #tpu.memory_space<vmem>>, vector<4x1xf32>
    %44 = vector.broadcast %43 : vector<4x1xf32> to vector<4x512xf32>
    %45 = arith.addf %42, %44 : vector<4x512xf32>
    %c0_20 = arith.constant 0 : index
    %c0_21 = arith.constant 0 : index
    %46 = vector.load %arg1[%c0_20, %c0_21] : memref<4x512xf32, #tpu.memory_space<vmem>>, vector<4x512xf32>
    %c0_22 = arith.constant 0 : index
    %c0_23 = arith.constant 0 : index
    %47 = vector.load %arg3[%c0_22, %c0_23] : memref<4x4xf32, #tpu.memory_space<vmem>>, vector<4x1xf32>
    %c0_24 = arith.constant 0 : index
    %c0_25 = arith.constant 0 : index
    %48 = vector.load %arg4[%c0_24, %c0_25] : memref<4x4xf32, #tpu.memory_space<vmem>>, vector<4x1xf32>
    %49 = arith.mulf %46, %46 : vector<4x512xf32>
    %50 = tpu.concatenate %46, %49 in 0 : vector<4x512xf32>, vector<4x512xf32> -> vector<8x512xf32>
    %cst_26 = arith.constant dense<0.000000e+00> : vector<8xf32>
    %51 = vector.multi_reduction <add>, %50, %cst_26 [1] : vector<8x512xf32> to vector<8xf32>
    %52 = vector.shape_cast %51 : vector<8xf32> to vector<8x1xf32>
    %53 = vector.extract_strided_slice %52 {offsets = [0, 0], sizes = [4, 1], strides = [1, 1]} : vector<8x1xf32> to vector<4x1xf32>
    %cst_27 = arith.constant 0.001953125 : f32
    %54 = vector.broadcast %cst_27 : f32 to vector<4x1xf32>
    %55 = arith.mulf %53, %54 : vector<4x1xf32>
    %56 = vector.extract_strided_slice %52 {offsets = [4, 0], sizes = [4, 1], strides = [1, 1]} : vector<8x1xf32> to vector<4x1xf32>
    %cst_28 = arith.constant 0.001953125 : f32
    %57 = vector.broadcast %cst_28 : f32 to vector<4x1xf32>
    %58 = arith.mulf %56, %57 : vector<4x1xf32>
    %59 = arith.mulf %55, %55 : vector<4x1xf32>
    %60 = arith.subf %58, %59 : vector<4x1xf32>
    %cst_29 = arith.constant 0.000000e+00 : f32
    %61 = vector.broadcast %cst_29 : f32 to vector<4x1xf32>
    %62 = arith.maximumf %60, %61 : vector<4x1xf32>
    %63 = vector.broadcast %55 : vector<4x1xf32> to vector<4x512xf32>
    %64 = arith.subf %46, %63 : vector<4x512xf32>
    %cst_30 = arith.constant 9.99999974E-6 : f32
    %65 = vector.broadcast %cst_30 : f32 to vector<4x1xf32>
    %66 = arith.addf %62, %65 : vector<4x1xf32>
    %67 = math.rsqrt %66 : vector<4x1xf32>
    %68 = arith.mulf %67, %47 : vector<4x1xf32>
    %69 = vector.broadcast %68 : vector<4x1xf32> to vector<4x512xf32>
    %70 = arith.mulf %64, %69 : vector<4x512xf32>
    %71 = vector.broadcast %48 : vector<4x1xf32> to vector<4x512xf32>
    %72 = arith.addf %70, %71 : vector<4x512xf32>
    %cst_31 = arith.constant 0.000000e+00 : f32
    %73 = vector.broadcast %cst_31 : f32 to vector<4x512xf32>
    %74 = arith.maximumf %72, %73 : vector<4x512xf32>
    %c16_i32 = arith.constant 16 : i32
    %75 = tpu.dynamic_rotate %74 by %c16_i32 dim 1 : vector<4x512xf32>, i32 -> vector<4x512xf32>
    %76 = arith.mulf %75, %2 : vector<4x512xf32>
    %c496_i32 = arith.constant 496 : i32
    %77 = tpu.dynamic_rotate %74 by %c496_i32 dim 1 : vector<4x512xf32>, i32 -> vector<4x512xf32>
    %78 = arith.mulf %77, %5 : vector<4x512xf32>
    %79 = tpu.concatenate %76, %74, %78 in 0 : vector<4x512xf32>, vector<4x512xf32>, vector<4x512xf32> -> vector<12x512xf32>
    %c1_i32 = arith.constant 1 : i32
    %80 = tpu.dynamic_rotate %79 by %c1_i32 dim 1 : vector<12x512xf32>, i32 -> vector<12x512xf32>
    %81 = arith.mulf %80, %8 : vector<12x512xf32>
    %c511_i32 = arith.constant 511 : i32
    %82 = tpu.dynamic_rotate %79 by %c511_i32 dim 1 : vector<12x512xf32>, i32 -> vector<12x512xf32>
    %83 = arith.mulf %82, %11 : vector<12x512xf32>
    %84 = tpu.concatenate %81, %79, %83 in 0 : vector<12x512xf32>, vector<12x512xf32>, vector<12x512xf32> -> vector<36x512xf32>
    %c0_32 = arith.constant 0 : index
    %c0_33 = arith.constant 0 : index
    %c0_34 = arith.constant 0 : index
    %85 = vector.load %arg5[%c0_32, %c0_33, %c0_34] : memref<4x4x36xf32, #tpu.memory_space<vmem>>, vector<1x4x36xf32>
    %86 = vector.shape_cast %85 : vector<1x4x36xf32> to vector<4x36xf32>
    %cst_35 = arith.constant dense<0.000000e+00> : vector<4x512xf32>
    %87 = tpu.matmul %86, %84, %cst_35 {dimension_numbers = #tpu.dot_dimension_numbers<[1], [0], [0], [1], [0, 0, 1, 1], [], []>} : vector<4x36xf32>, vector<36x512xf32>, vector<4x512xf32> -> vector<4x512xf32>
    %c0_36 = arith.constant 0 : index
    %c0_37 = arith.constant 0 : index
    %88 = vector.load %arg6[%c0_36, %c0_37] : memref<4x4xf32, #tpu.memory_space<vmem>>, vector<4x1xf32>
    %89 = vector.broadcast %88 : vector<4x1xf32> to vector<4x512xf32>
    %90 = arith.addf %87, %89 : vector<4x512xf32>
    %c0_38 = arith.constant 0 : index
    %c1_39 = arith.constant 1 : index
    %91 = vector.load %arg3[%c0_38, %c1_39] : memref<4x4xf32, #tpu.memory_space<vmem>>, vector<4x1xf32>
    %c0_40 = arith.constant 0 : index
    %c1_41 = arith.constant 1 : index
    %92 = vector.load %arg4[%c0_40, %c1_41] : memref<4x4xf32, #tpu.memory_space<vmem>>, vector<4x1xf32>
    %93 = arith.mulf %90, %90 : vector<4x512xf32>
    %94 = tpu.concatenate %90, %93 in 0 : vector<4x512xf32>, vector<4x512xf32> -> vector<8x512xf32>
    %cst_42 = arith.constant dense<0.000000e+00> : vector<8xf32>
    %95 = vector.multi_reduction <add>, %94, %cst_42 [1] : vector<8x512xf32> to vector<8xf32>
    %96 = vector.shape_cast %95 : vector<8xf32> to vector<8x1xf32>
    %97 = vector.extract_strided_slice %96 {offsets = [0, 0], sizes = [4, 1], strides = [1, 1]} : vector<8x1xf32> to vector<4x1xf32>
    %cst_43 = arith.constant 0.001953125 : f32
    %98 = vector.broadcast %cst_43 : f32 to vector<4x1xf32>
    %99 = arith.mulf %97, %98 : vector<4x1xf32>
    %100 = vector.extract_strided_slice %96 {offsets = [4, 0], sizes = [4, 1], strides = [1, 1]} : vector<8x1xf32> to vector<4x1xf32>
    %cst_44 = arith.constant 0.001953125 : f32
    %101 = vector.broadcast %cst_44 : f32 to vector<4x1xf32>
    %102 = arith.mulf %100, %101 : vector<4x1xf32>
    %103 = arith.mulf %99, %99 : vector<4x1xf32>
    %104 = arith.subf %102, %103 : vector<4x1xf32>
    %cst_45 = arith.constant 0.000000e+00 : f32
    %105 = vector.broadcast %cst_45 : f32 to vector<4x1xf32>
    %106 = arith.maximumf %104, %105 : vector<4x1xf32>
    %107 = vector.broadcast %99 : vector<4x1xf32> to vector<4x512xf32>
    %108 = arith.subf %90, %107 : vector<4x512xf32>
    %cst_46 = arith.constant 9.99999974E-6 : f32
    %109 = vector.broadcast %cst_46 : f32 to vector<4x1xf32>
    %110 = arith.addf %106, %109 : vector<4x1xf32>
    %111 = math.rsqrt %110 : vector<4x1xf32>
    %112 = arith.mulf %111, %91 : vector<4x1xf32>
    %113 = vector.broadcast %112 : vector<4x1xf32> to vector<4x512xf32>
    %114 = arith.mulf %108, %113 : vector<4x512xf32>
    %115 = vector.broadcast %92 : vector<4x1xf32> to vector<4x512xf32>
    %116 = arith.addf %114, %115 : vector<4x512xf32>
    %cst_47 = arith.constant 0.000000e+00 : f32
    %117 = vector.broadcast %cst_47 : f32 to vector<4x512xf32>
    %118 = arith.maximumf %116, %117 : vector<4x512xf32>
    %c16_i32_48 = arith.constant 16 : i32
    %119 = tpu.dynamic_rotate %118 by %c16_i32_48 dim 1 : vector<4x512xf32>, i32 -> vector<4x512xf32>
    %120 = arith.mulf %119, %2 : vector<4x512xf32>
    %c496_i32_49 = arith.constant 496 : i32
    %121 = tpu.dynamic_rotate %118 by %c496_i32_49 dim 1 : vector<4x512xf32>, i32 -> vector<4x512xf32>
    %122 = arith.mulf %121, %5 : vector<4x512xf32>
    %123 = tpu.concatenate %120, %118, %122 in 0 : vector<4x512xf32>, vector<4x512xf32>, vector<4x512xf32> -> vector<12x512xf32>
    %c1_i32_50 = arith.constant 1 : i32
    %124 = tpu.dynamic_rotate %123 by %c1_i32_50 dim 1 : vector<12x512xf32>, i32 -> vector<12x512xf32>
    %125 = arith.mulf %124, %8 : vector<12x512xf32>
    %c511_i32_51 = arith.constant 511 : i32
    %126 = tpu.dynamic_rotate %123 by %c511_i32_51 dim 1 : vector<12x512xf32>, i32 -> vector<12x512xf32>
    %127 = arith.mulf %126, %11 : vector<12x512xf32>
    %128 = tpu.concatenate %125, %123, %127 in 0 : vector<12x512xf32>, vector<12x512xf32>, vector<12x512xf32> -> vector<36x512xf32>
    %c1_52 = arith.constant 1 : index
    %c0_53 = arith.constant 0 : index
    %c0_54 = arith.constant 0 : index
    %129 = vector.load %arg5[%c1_52, %c0_53, %c0_54] : memref<4x4x36xf32, #tpu.memory_space<vmem>>, vector<1x4x36xf32>
    %130 = vector.shape_cast %129 : vector<1x4x36xf32> to vector<4x36xf32>
    %cst_55 = arith.constant dense<0.000000e+00> : vector<4x512xf32>
    %131 = tpu.matmul %130, %128, %cst_55 {dimension_numbers = #tpu.dot_dimension_numbers<[1], [0], [0], [1], [0, 0, 1, 1], [], []>} : vector<4x36xf32>, vector<36x512xf32>, vector<4x512xf32> -> vector<4x512xf32>
    %c0_56 = arith.constant 0 : index
    %c1_57 = arith.constant 1 : index
    %132 = vector.load %arg6[%c0_56, %c1_57] : memref<4x4xf32, #tpu.memory_space<vmem>>, vector<4x1xf32>
    %133 = vector.broadcast %132 : vector<4x1xf32> to vector<4x512xf32>
    %134 = arith.addf %131, %133 : vector<4x512xf32>
    %135 = arith.addf %134, %46 : vector<4x512xf32>
    %c8 = arith.constant 8 : index
    %c0_58 = arith.constant 0 : index
    %136 = vector.load %arg7[%c8, %c0_58] : memref<16x1xf32, #tpu.memory_space<vmem>>, vector<4x1xf32>
    %c8_59 = arith.constant 8 : index
    %c0_60 = arith.constant 0 : index
    %137 = vector.load %arg8[%c8_59, %c0_60] : memref<16x1xf32, #tpu.memory_space<vmem>>, vector<4x1xf32>
    %138 = arith.mulf %135, %135 : vector<4x512xf32>
    %139 = tpu.concatenate %135, %138 in 0 : vector<4x512xf32>, vector<4x512xf32> -> vector<8x512xf32>
    %cst_61 = arith.constant dense<0.000000e+00> : vector<8xf32>
    %140 = vector.multi_reduction <add>, %139, %cst_61 [1] : vector<8x512xf32> to vector<8xf32>
    %141 = vector.shape_cast %140 : vector<8xf32> to vector<8x1xf32>
    %142 = vector.extract_strided_slice %141 {offsets = [0, 0], sizes = [4, 1], strides = [1, 1]} : vector<8x1xf32> to vector<4x1xf32>
    %cst_62 = arith.constant 0.001953125 : f32
    %143 = vector.broadcast %cst_62 : f32 to vector<4x1xf32>
    %144 = arith.mulf %142, %143 : vector<4x1xf32>
    %145 = vector.extract_strided_slice %141 {offsets = [4, 0], sizes = [4, 1], strides = [1, 1]} : vector<8x1xf32> to vector<4x1xf32>
    %cst_63 = arith.constant 0.001953125 : f32
    %146 = vector.broadcast %cst_63 : f32 to vector<4x1xf32>
    %147 = arith.mulf %145, %146 : vector<4x1xf32>
    %148 = arith.mulf %144, %144 : vector<4x1xf32>
    %149 = arith.subf %147, %148 : vector<4x1xf32>
    %cst_64 = arith.constant 0.000000e+00 : f32
    %150 = vector.broadcast %cst_64 : f32 to vector<4x1xf32>
    %151 = arith.maximumf %149, %150 : vector<4x1xf32>
    %152 = vector.broadcast %144 : vector<4x1xf32> to vector<4x512xf32>
    %153 = arith.subf %135, %152 : vector<4x512xf32>
    %cst_65 = arith.constant 9.99999974E-6 : f32
    %154 = vector.broadcast %cst_65 : f32 to vector<4x1xf32>
    %155 = arith.addf %151, %154 : vector<4x1xf32>
    %156 = math.rsqrt %155 : vector<4x1xf32>
    %157 = arith.mulf %156, %136 : vector<4x1xf32>
    %158 = vector.broadcast %157 : vector<4x1xf32> to vector<4x512xf32>
    %159 = arith.mulf %153, %158 : vector<4x512xf32>
    %160 = vector.broadcast %137 : vector<4x1xf32> to vector<4x512xf32>
    %161 = arith.addf %159, %160 : vector<4x512xf32>
    %cst_66 = arith.constant 0.000000e+00 : f32
    %162 = vector.broadcast %cst_66 : f32 to vector<4x512xf32>
    %163 = arith.maximumf %161, %162 : vector<4x512xf32>
    %c0_67 = arith.constant 0 : index
    %c8_68 = arith.constant 8 : index
    %164 = vector.load %arg9[%c0_67, %c8_68] : memref<4x16xf32, #tpu.memory_space<vmem>>, vector<4x4xf32>
    %cst_69 = arith.constant dense<0.000000e+00> : vector<4x512xf32>
    %165 = tpu.matmul %164, %163, %cst_69 {dimension_numbers = #tpu.dot_dimension_numbers<[1], [0], [0], [1], [0, 0, 1, 1], [], []>} : vector<4x4xf32>, vector<4x512xf32>, vector<4x512xf32> -> vector<4x512xf32>
    %166 = arith.addf %45, %165 : vector<4x512xf32>
    %c0_70 = arith.constant 0 : index
    %c2_71 = arith.constant 2 : index
    %167 = vector.load %arg3[%c0_70, %c2_71] : memref<4x4xf32, #tpu.memory_space<vmem>>, vector<4x1xf32>
    %c0_72 = arith.constant 0 : index
    %c2_73 = arith.constant 2 : index
    %168 = vector.load %arg4[%c0_72, %c2_73] : memref<4x4xf32, #tpu.memory_space<vmem>>, vector<4x1xf32>
    %169 = arith.mulf %135, %135 : vector<4x512xf32>
    %170 = tpu.concatenate %135, %169 in 0 : vector<4x512xf32>, vector<4x512xf32> -> vector<8x512xf32>
    %cst_74 = arith.constant dense<0.000000e+00> : vector<8xf32>
    %171 = vector.multi_reduction <add>, %170, %cst_74 [1] : vector<8x512xf32> to vector<8xf32>
    %172 = vector.shape_cast %171 : vector<8xf32> to vector<8x1xf32>
    %173 = vector.extract_strided_slice %172 {offsets = [0, 0], sizes = [4, 1], strides = [1, 1]} : vector<8x1xf32> to vector<4x1xf32>
    %cst_75 = arith.constant 0.001953125 : f32
    %174 = vector.broadcast %cst_75 : f32 to vector<4x1xf32>
    %175 = arith.mulf %173, %174 : vector<4x1xf32>
    %176 = vector.extract_strided_slice %172 {offsets = [4, 0], sizes = [4, 1], strides = [1, 1]} : vector<8x1xf32> to vector<4x1xf32>
    %cst_76 = arith.constant 0.001953125 : f32
    %177 = vector.broadcast %cst_76 : f32 to vector<4x1xf32>
    %178 = arith.mulf %176, %177 : vector<4x1xf32>
    %179 = arith.mulf %175, %175 : vector<4x1xf32>
    %180 = arith.subf %178, %179 : vector<4x1xf32>
    %cst_77 = arith.constant 0.000000e+00 : f32
    %181 = vector.broadcast %cst_77 : f32 to vector<4x1xf32>
    %182 = arith.maximumf %180, %181 : vector<4x1xf32>
    %183 = vector.broadcast %175 : vector<4x1xf32> to vector<4x512xf32>
    %184 = arith.subf %135, %183 : vector<4x512xf32>
    %cst_78 = arith.constant 9.99999974E-6 : f32
    %185 = vector.broadcast %cst_78 : f32 to vector<4x1xf32>
    %186 = arith.addf %182, %185 : vector<4x1xf32>
    %187 = math.rsqrt %186 : vector<4x1xf32>
    %188 = arith.mulf %187, %167 : vector<4x1xf32>
    %189 = vector.broadcast %188 : vector<4x1xf32> to vector<4x512xf32>
    %190 = arith.mulf %184, %189 : vector<4x512xf32>
    %191 = vector.broadcast %168 : vector<4x1xf32> to vector<4x512xf32>
    %192 = arith.addf %190, %191 : vector<4x512xf32>
    %cst_79 = arith.constant 0.000000e+00 : f32
    %193 = vector.broadcast %cst_79 : f32 to vector<4x512xf32>
    %194 = arith.maximumf %192, %193 : vector<4x512xf32>
    %c16_i32_80 = arith.constant 16 : i32
    %195 = tpu.dynamic_rotate %194 by %c16_i32_80 dim 1 : vector<4x512xf32>, i32 -> vector<4x512xf32>
    %196 = arith.mulf %195, %2 : vector<4x512xf32>
    %c496_i32_81 = arith.constant 496 : i32
    %197 = tpu.dynamic_rotate %194 by %c496_i32_81 dim 1 : vector<4x512xf32>, i32 -> vector<4x512xf32>
    %198 = arith.mulf %197, %5 : vector<4x512xf32>
    %199 = tpu.concatenate %196, %194, %198 in 0 : vector<4x512xf32>, vector<4x512xf32>, vector<4x512xf32> -> vector<12x512xf32>
    %c1_i32_82 = arith.constant 1 : i32
    %200 = tpu.dynamic_rotate %199 by %c1_i32_82 dim 1 : vector<12x512xf32>, i32 -> vector<12x512xf32>
    %201 = arith.mulf %200, %8 : vector<12x512xf32>
    %c511_i32_83 = arith.constant 511 : i32
    %202 = tpu.dynamic_rotate %199 by %c511_i32_83 dim 1 : vector<12x512xf32>, i32 -> vector<12x512xf32>
    %203 = arith.mulf %202, %11 : vector<12x512xf32>
    %204 = tpu.concatenate %201, %199, %203 in 0 : vector<12x512xf32>, vector<12x512xf32>, vector<12x512xf32> -> vector<36x512xf32>
    %c2_84 = arith.constant 2 : index
    %c0_85 = arith.constant 0 : index
    %c0_86 = arith.constant 0 : index
    %205 = vector.load %arg5[%c2_84, %c0_85, %c0_86] : memref<4x4x36xf32, #tpu.memory_space<vmem>>, vector<1x4x36xf32>
    %206 = vector.shape_cast %205 : vector<1x4x36xf32> to vector<4x36xf32>
    %cst_87 = arith.constant dense<0.000000e+00> : vector<4x512xf32>
    %207 = tpu.matmul %206, %204, %cst_87 {dimension_numbers = #tpu.dot_dimension_numbers<[1], [0], [0], [1], [0, 0, 1, 1], [], []>} : vector<4x36xf32>, vector<36x512xf32>, vector<4x512xf32> -> vector<4x512xf32>
    %c0_88 = arith.constant 0 : index
    %c2_89 = arith.constant 2 : index
    %208 = vector.load %arg6[%c0_88, %c2_89] : memref<4x4xf32, #tpu.memory_space<vmem>>, vector<4x1xf32>
    %209 = vector.broadcast %208 : vector<4x1xf32> to vector<4x512xf32>
    %210 = arith.addf %207, %209 : vector<4x512xf32>
    %c0_90 = arith.constant 0 : index
    %c3_91 = arith.constant 3 : index
    %211 = vector.load %arg3[%c0_90, %c3_91] : memref<4x4xf32, #tpu.memory_space<vmem>>, vector<4x1xf32>
    %c0_92 = arith.constant 0 : index
    %c3_93 = arith.constant 3 : index
    %212 = vector.load %arg4[%c0_92, %c3_93] : memref<4x4xf32, #tpu.memory_space<vmem>>, vector<4x1xf32>
    %213 = arith.mulf %210, %210 : vector<4x512xf32>
    %214 = tpu.concatenate %210, %213 in 0 : vector<4x512xf32>, vector<4x512xf32> -> vector<8x512xf32>
    %cst_94 = arith.constant dense<0.000000e+00> : vector<8xf32>
    %215 = vector.multi_reduction <add>, %214, %cst_94 [1] : vector<8x512xf32> to vector<8xf32>
    %216 = vector.shape_cast %215 : vector<8xf32> to vector<8x1xf32>
    %217 = vector.extract_strided_slice %216 {offsets = [0, 0], sizes = [4, 1], strides = [1, 1]} : vector<8x1xf32> to vector<4x1xf32>
    %cst_95 = arith.constant 0.001953125 : f32
    %218 = vector.broadcast %cst_95 : f32 to vector<4x1xf32>
    %219 = arith.mulf %217, %218 : vector<4x1xf32>
    %220 = vector.extract_strided_slice %216 {offsets = [4, 0], sizes = [4, 1], strides = [1, 1]} : vector<8x1xf32> to vector<4x1xf32>
    %cst_96 = arith.constant 0.001953125 : f32
    %221 = vector.broadcast %cst_96 : f32 to vector<4x1xf32>
    %222 = arith.mulf %220, %221 : vector<4x1xf32>
    %223 = arith.mulf %219, %219 : vector<4x1xf32>
    %224 = arith.subf %222, %223 : vector<4x1xf32>
    %cst_97 = arith.constant 0.000000e+00 : f32
    %225 = vector.broadcast %cst_97 : f32 to vector<4x1xf32>
    %226 = arith.maximumf %224, %225 : vector<4x1xf32>
    %227 = vector.broadcast %219 : vector<4x1xf32> to vector<4x512xf32>
    %228 = arith.subf %210, %227 : vector<4x512xf32>
    %cst_98 = arith.constant 9.99999974E-6 : f32
    %229 = vector.broadcast %cst_98 : f32 to vector<4x1xf32>
    %230 = arith.addf %226, %229 : vector<4x1xf32>
    %231 = math.rsqrt %230 : vector<4x1xf32>
    %232 = arith.mulf %231, %211 : vector<4x1xf32>
    %233 = vector.broadcast %232 : vector<4x1xf32> to vector<4x512xf32>
    %234 = arith.mulf %228, %233 : vector<4x512xf32>
    %235 = vector.broadcast %212 : vector<4x1xf32> to vector<4x512xf32>
    %236 = arith.addf %234, %235 : vector<4x512xf32>
    %cst_99 = arith.constant 0.000000e+00 : f32
    %237 = vector.broadcast %cst_99 : f32 to vector<4x512xf32>
    %238 = arith.maximumf %236, %237 : vector<4x512xf32>
    %c16_i32_100 = arith.constant 16 : i32
    %239 = tpu.dynamic_rotate %238 by %c16_i32_100 dim 1 : vector<4x512xf32>, i32 -> vector<4x512xf32>
    %240 = arith.mulf %239, %2 : vector<4x512xf32>
    %c496_i32_101 = arith.constant 496 : i32
    %241 = tpu.dynamic_rotate %238 by %c496_i32_101 dim 1 : vector<4x512xf32>, i32 -> vector<4x512xf32>
    %242 = arith.mulf %241, %5 : vector<4x512xf32>
    %243 = tpu.concatenate %240, %238, %242 in 0 : vector<4x512xf32>, vector<4x512xf32>, vector<4x512xf32> -> vector<12x512xf32>
    %c1_i32_102 = arith.constant 1 : i32
    %244 = tpu.dynamic_rotate %243 by %c1_i32_102 dim 1 : vector<12x512xf32>, i32 -> vector<12x512xf32>
    %245 = arith.mulf %244, %8 : vector<12x512xf32>
    %c511_i32_103 = arith.constant 511 : i32
    %246 = tpu.dynamic_rotate %243 by %c511_i32_103 dim 1 : vector<12x512xf32>, i32 -> vector<12x512xf32>
    %247 = arith.mulf %246, %11 : vector<12x512xf32>
    %248 = tpu.concatenate %245, %243, %247 in 0 : vector<12x512xf32>, vector<12x512xf32>, vector<12x512xf32> -> vector<36x512xf32>
    %c3_104 = arith.constant 3 : index
    %c0_105 = arith.constant 0 : index
    %c0_106 = arith.constant 0 : index
    %249 = vector.load %arg5[%c3_104, %c0_105, %c0_106] : memref<4x4x36xf32, #tpu.memory_space<vmem>>, vector<1x4x36xf32>
    %250 = vector.shape_cast %249 : vector<1x4x36xf32> to vector<4x36xf32>
    %cst_107 = arith.constant dense<0.000000e+00> : vector<4x512xf32>
    %251 = tpu.matmul %250, %248, %cst_107 {dimension_numbers = #tpu.dot_dimension_numbers<[1], [0], [0], [1], [0, 0, 1, 1], [], []>} : vector<4x36xf32>, vector<36x512xf32>, vector<4x512xf32> -> vector<4x512xf32>
    %c0_108 = arith.constant 0 : index
    %c3_109 = arith.constant 3 : index
    %252 = vector.load %arg6[%c0_108, %c3_109] : memref<4x4xf32, #tpu.memory_space<vmem>>, vector<4x1xf32>
    %253 = vector.broadcast %252 : vector<4x1xf32> to vector<4x512xf32>
    %254 = arith.addf %251, %253 : vector<4x512xf32>
    %255 = arith.addf %254, %135 : vector<4x512xf32>
    %c12 = arith.constant 12 : index
    %c0_110 = arith.constant 0 : index
    %256 = vector.load %arg7[%c12, %c0_110] : memref<16x1xf32, #tpu.memory_space<vmem>>, vector<4x1xf32>
    %c12_111 = arith.constant 12 : index
    %c0_112 = arith.constant 0 : index
    %257 = vector.load %arg8[%c12_111, %c0_112] : memref<16x1xf32, #tpu.memory_space<vmem>>, vector<4x1xf32>
    %258 = arith.mulf %255, %255 : vector<4x512xf32>
    %259 = tpu.concatenate %255, %258 in 0 : vector<4x512xf32>, vector<4x512xf32> -> vector<8x512xf32>
    %cst_113 = arith.constant dense<0.000000e+00> : vector<8xf32>
    %260 = vector.multi_reduction <add>, %259, %cst_113 [1] : vector<8x512xf32> to vector<8xf32>
    %261 = vector.shape_cast %260 : vector<8xf32> to vector<8x1xf32>
    %262 = vector.extract_strided_slice %261 {offsets = [0, 0], sizes = [4, 1], strides = [1, 1]} : vector<8x1xf32> to vector<4x1xf32>
    %cst_114 = arith.constant 0.001953125 : f32
    %263 = vector.broadcast %cst_114 : f32 to vector<4x1xf32>
    %264 = arith.mulf %262, %263 : vector<4x1xf32>
    %265 = vector.extract_strided_slice %261 {offsets = [4, 0], sizes = [4, 1], strides = [1, 1]} : vector<8x1xf32> to vector<4x1xf32>
    %cst_115 = arith.constant 0.001953125 : f32
    %266 = vector.broadcast %cst_115 : f32 to vector<4x1xf32>
    %267 = arith.mulf %265, %266 : vector<4x1xf32>
    %268 = arith.mulf %264, %264 : vector<4x1xf32>
    %269 = arith.subf %267, %268 : vector<4x1xf32>
    %cst_116 = arith.constant 0.000000e+00 : f32
    %270 = vector.broadcast %cst_116 : f32 to vector<4x1xf32>
    %271 = arith.maximumf %269, %270 : vector<4x1xf32>
    %272 = vector.broadcast %264 : vector<4x1xf32> to vector<4x512xf32>
    %273 = arith.subf %255, %272 : vector<4x512xf32>
    %cst_117 = arith.constant 9.99999974E-6 : f32
    %274 = vector.broadcast %cst_117 : f32 to vector<4x1xf32>
    %275 = arith.addf %271, %274 : vector<4x1xf32>
    %276 = math.rsqrt %275 : vector<4x1xf32>
    %277 = arith.mulf %276, %256 : vector<4x1xf32>
    %278 = vector.broadcast %277 : vector<4x1xf32> to vector<4x512xf32>
    %279 = arith.mulf %273, %278 : vector<4x512xf32>
    %280 = vector.broadcast %257 : vector<4x1xf32> to vector<4x512xf32>
    %281 = arith.addf %279, %280 : vector<4x512xf32>
    %cst_118 = arith.constant 0.000000e+00 : f32
    %282 = vector.broadcast %cst_118 : f32 to vector<4x512xf32>
    %283 = arith.maximumf %281, %282 : vector<4x512xf32>
    %c0_119 = arith.constant 0 : index
    %c12_120 = arith.constant 12 : index
    %284 = vector.load %arg9[%c0_119, %c12_120] : memref<4x16xf32, #tpu.memory_space<vmem>>, vector<4x4xf32>
    %cst_121 = arith.constant dense<0.000000e+00> : vector<4x512xf32>
    %285 = tpu.matmul %284, %283, %cst_121 {dimension_numbers = #tpu.dot_dimension_numbers<[1], [0], [0], [1], [0, 0, 1, 1], [], []>} : vector<4x4xf32>, vector<4x512xf32>, vector<4x512xf32> -> vector<4x512xf32>
    %286 = arith.addf %166, %285 : vector<4x512xf32>
    %c0_122 = arith.constant 0 : index
    %c0_123 = arith.constant 0 : index
    %287 = vector.load %arg12[%c0_122, %c0_123] : memref<4x512xf32, #tpu.memory_space<vmem>>, vector<4x512xf32>
    tpu.vector_store %arg12[%c0_122, %c0_123], %286 {strides = array<i32>} : memref<4x512xf32, #tpu.memory_space<vmem>>, vector<4x512xf32>,
    return
  }
  func.func @transform_0(%arg0: i32) -> (i32, i32) {
    %c0_i32 = arith.constant 0 : i32
    %c0_i32_0 = arith.constant 0 : i32
    %c0_i32_1 = arith.constant 0 : i32
    return %c0_i32, %c0_i32_0 : i32, i32
  }
  func.func @transform_1(%arg0: i32) -> (i32, i32) {
    %c0_i32 = arith.constant 0 : i32
    %c0_i32_0 = arith.constant 0 : i32
    %c0_i32_1 = arith.constant 0 : i32
    return %c0_i32, %c0_i32_0 : i32, i32
  }
  func.func @transform_2(%arg0: i32) -> (i32, i32) {
    %c0_i32 = arith.constant 0 : i32
    %c0_i32_0 = arith.constant 0 : i32
    %c0_i32_1 = arith.constant 0 : i32
    return %c0_i32, %c0_i32_0 : i32, i32
  }
  func.func @transform_3(%arg0: i32) -> (i32, i32) {
    %c0_i32 = arith.constant 0 : i32
    %c0_i32_0 = arith.constant 0 : i32
    %c0_i32_1 = arith.constant 0 : i32
    return %c0_i32, %c0_i32_0 : i32, i32
  }
  func.func @transform_4(%arg0: i32) -> (i32, i32, i32) {
    %c0_i32 = arith.constant 0 : i32
    %c0_i32_0 = arith.constant 0 : i32
    %c0_i32_1 = arith.constant 0 : i32
    %c0_i32_2 = arith.constant 0 : i32
    return %c0_i32, %c0_i32_0, %c0_i32_1 : i32, i32, i32
  }
  func.func @transform_5(%arg0: i32) -> (i32, i32) {
    %c0_i32 = arith.constant 0 : i32
    %c0_i32_0 = arith.constant 0 : i32
    %c0_i32_1 = arith.constant 0 : i32
    return %c0_i32, %c0_i32_0 : i32, i32
  }
  func.func @transform_6(%arg0: i32) -> (i32, i32) {
    %c0_i32 = arith.constant 0 : i32
    %c0_i32_0 = arith.constant 0 : i32
    %c0_i32_1 = arith.constant 0 : i32
    return %c0_i32, %c0_i32_0 : i32, i32
  }
  func.func @transform_7(%arg0: i32) -> (i32, i32) {
    %c0_i32 = arith.constant 0 : i32
    %c0_i32_0 = arith.constant 0 : i32
    %c0_i32_1 = arith.constant 0 : i32
    return %c0_i32, %c0_i32_0 : i32, i32
  }
  func.func @transform_8(%arg0: i32) -> (i32, i32) {
    %c0_i32 = arith.constant 0 : i32
    %c0_i32_0 = arith.constant 0 : i32
    %c0_i32_1 = arith.constant 0 : i32
    return %c0_i32, %c0_i32_0 : i32, i32
  }
  func.func @transform_9(%arg0: i32) -> (i32, i32) {
    %c0_i32 = arith.constant 0 : i32
    %c0_i32_0 = arith.constant 0 : i32
    %c0_i32_1 = arith.constant 0 : i32
    return %c0_i32, %c0_i32_0 : i32, i32
  }
  func.func @transform_10(%arg0: i32) -> (i32, i32) {
    %c0_i32 = arith.constant 0 : i32
    %c0_i32_0 = arith.constant 0 : i32
    %c0_i32_1 = arith.constant 0 : i32
    return %c0_i32, %c0_i32_0 : i32, i32
  }
  func.func @transform_11(%arg0: i32) -> (i32, i32) {
    %c0_i32 = arith.constant 0 : i32
    %c0_i32_0 = arith.constant 0 : i32
    %c0_i32_1 = arith.constant 0 : i32
    return %c0_i32, %c0_i32_0 : i32, i32
  }
}

</mosaic_0001>

<bundles_post_ra>
// kernel: memory_block_forward.1
= control target key start
LH: loop header
LB: loop body
LE: loop exit
PB: predicated region body
PF: predicated region fallthrough
CT: control target
= control target key end

     0   :  { %vm354_vm0 = vcmask 1043456   ;;  %v2389_v2 = vmov 0   ;;  %v40_v44 = vlaneseq  ;;  %v2390_v45 = vmov 839922192   ;;  %s2392_s17 = smov 16   ;;  %s2393_s18 = smov 112   ;;  %s3488_s0 = inlined_call_operand.vmem [shape: f32[4,512], index: 0, kind: input, shape index: {}]   ;;  %s3489_s3 = inlined_call_operand.vmem [shape: f32[4,4], index: 3, kind: input, shape index: {}]   ;;  %s3490_s1 = inlined_call_operand.vmem [shape: f32[8,512], index: 1, kind: input, shape index: {}]   ;;  %s3491_s2 = inlined_call_operand.vmem [shape: f32[4,4], index: 2, kind: input, shape index: {}]   ;;  %s3492_s10 = inlined_call_operand.vmem [shape: f32[4,512], index: 10, kind: input, shape index: {}]   ;;  %s3493_s7 = inlined_call_operand.vmem [shape: f32[16,1], index: 7, kind: input, shape index: {}]   ;;  %s3494_s6 = inlined_call_operand.vmem [shape: f32[16,1], index: 6, kind: input, shape index: {}]   ;;  %s3495_s8 = inlined_call_operand.vmem [shape: f32[4,16], index: 8, kind: input, shape index: {}]   ;;  %s3496_s5 = inlined_call_operand.vmem [shape: f32[4,4], index: 5, kind: input, shape index: {}]   ;;  %s3497_s4 = inlined_call_operand.vmem [shape: f32[4,4,36], index: 4, kind: input, shape index: {}]   ;;  %s3498_s9 = inlined_call_operand.vmem [shape: f32[4,1], index: 9, kind: input, shape index: {}]   ;;  %s3499_s11 = inlined_call_operand.vmem [shape: f32[4,512], index: 11, kind: output, shape index: {}]  }
   0x1   :  { %v2467_v0 = vld [vmem:[%s3488_s0] sm:$0xff]  ;;  %v2472_v1 = vld [vmem:[%s3488_s0 + $0x8] sm:$0xff]  ;;  %2361 = vset.pattern.permute.xlu1 %v2389_v2  ;;  %2360 = vset.pattern.permute.xlu0 %v2389_v2  ;;  %v2514_v20 = vld [vmem:[%s3490_s1 + $0x10] sm:$0xff]  ;;  %v373_v46 = vunpack.c.l.s4 %v2390_v45  ;;  %v2391_v51 = vmov 1985246804   ;;  %s2394_s27 = smov 127  }
   0x2   :  { %v339_v3 = vld [vmem:[%s3489_s3] sm:$0xf]  ;;  %v340_v4 = vmul.f32 %v2467_v0, %v2467_v0  ;;  %v341_v5 = vmul.f32 %v2472_v1, %v2472_v1  ;;  %v2485_v6 = vcombine.high %v2467_v0, %v2467_v0  ;;  %v2489_v7 = vcombine.high %v2472_v1, %v2472_v1  ;;  %v2507_v18 = vld [vmem:[%s3490_s1 + $0x8] sm:$0xff]  ;;  %v2524_v24 = vld [vmem:[%s3490_s1 + $0x18] sm:$0xff]  ;;  %s2398_s24 = smov 126   ;;  %s2400_s15 = smov 120  }
   0x3   :  { %404 = vperm.xlu1 %2361, %v339_v3   ;;  %v2502_v17 = vld [vmem:[%s3490_s1] sm:$0xff]  ;;  %v136_v23 = vmul.f32 %v2507_v18, %v2507_v18  ;;  %v137_v26 = vmul.f32 %v2514_v20, %v2514_v20  ;;  %v138_v27 = vmul.f32 %v2524_v24, %v2524_v24  ;;  %v41_v49 = vshrl.u32 %v40_v44, 7  ;;  %s2401_s20 = smov 125   ;;  %s2403_s22 = smov 116  }
   0x4   :  { %v350_v8 = vcombine.low %v340_v4, %v340_v4  ;;  %v351_v9 = vcombine.low %v341_v5, %v341_v5  ;;  %v356_v10 = vsel %vm354_vm0, %v2485_v6, %v340_v4  ;;  %v358_v14 = vsel %vm354_vm0, %v2489_v7, %v341_v5  ;;  %v338_v38 = vld [vmem:[%s3491_s2] sm:$0xf] }
   0x5   :  { %v139_v19 = vadd.f32 %v2507_v18, %v2502_v17  ;;  %v135_v22 = vmul.f32 %v2502_v17, %v2502_v17  ;;  %v385_v39 = vrot.slane %v338_v38, 4  ;;  %v374_v50 = vunpack.c.0.s8 %v373_v46 }
   0x6   :  { %v355_v11 = vsel %vm354_vm0, %v2467_v0, %v350_v8  ;;  %v357_v12 = vsel %vm354_vm0, %v2472_v1, %v351_v9  ;;  %v393_v52 = vunpack.c.l.s4 %v2391_v51  ;;  %v2541_v8 = vsub.s32 1, %v41_v49 }
   0x7   :  { %v359_v13 = vadd.f32 %v356_v10, %v355_v11  ;;  %v140_v21 = vadd.f32 %v139_v19, %v2514_v20  ;;  %v144_v28 = vadd.f32 %v136_v23, %v135_v22  ;;  %v377_v55 = vsub.s32 %v374_v50, %v41_v49 }
   0x8   :  { %v394_v56 = vunpack.c.0.s8 %v393_v52  ;;  %v2543_v9 = vsub.s32 0, %v41_v49  ;;  %vm190_vm3 = vcmask 64512   ;;  %vm573_vm6 = vcmask 293888  }
   0x9   :  { %v360_v15 = vadd.f32 %v359_v13, %v357_v12  ;;  %v141_v25 = vadd.f32 %v140_v21, %v2524_v24  ;;  %v145_v29 = vadd.f32 %v144_v28, %v137_v26  ;;  %v2545_v12 = vsub.s32 3, %v41_v49 }
   0xa   :  { %v397_v59 = vsub.s32 %v394_v56, %v41_v49  ;;  %v50_v13 = vsub.s32 2, %v41_v49  ;;  %vm1182_vm7 = vcmask 31744  }
   0xb   :  { %v361_v16 = vadd.f32 %v360_v15, %v358_v14  ;;  %v146_v30 = vadd.f32 %v145_v29, %v138_v27  ;;  %v2302_v14 = vld [vmem:[%s3492_s10 + $0x2] ss:$4 sm:$0xf] }
   0xc   :  { %v2560_v21 = vrot.slane %v2302_v14, %v2543_v9  ;;  %v2563_v22 = vrot.slane %v2302_v14, %v2545_v12  ;;  %v2575_v28 = vrot.slane %v2302_v14, %v50_v13 }
   0xd   :  { %362 = vadd.xlane.f32.xlu0 %v361_v16  ;;  %v2554_v16 = vrot.slane %v2302_v14, %v2541_v8 }
  0x27   :  { %142 = vadd.xlane.f32.xlu1 %v141_v25 }
  0x2b   :  { %147 = vadd.xlane.f32.xlu1 %v146_v30 }
  0x7e   :  { %v405_v42 = vpop.permute.xlu1 %404 }
  0x7f   :  { %v412_v62 = vrot.slane %v405_v42, %v377_v55 }
  0x96   :  { %v363_v31 = vpop.xlane.xlu0 %362 }
  0x97   :  { %v364_v32 = vmul.f32 0.001953125, %v363_v31 }
  0x99   :  { %v365_v33 = vmul.f32 %v364_v32, %v364_v32  ;;  %v378_v58 = vrot.slane %v364_v32, %v377_v55  ;;  %v2395_v55 = vmov 0.0  }
  0x9a   :  { %258 = vmatprep.mubr.f32.mxu0 %v2395_v55  ;;  %329 = vmatprep.mubr.f32.mxu1 %v2395_v55 }
  0x9b   :  { %v367_v34 = vrot.slane %v365_v33, 4  ;;  %v380_v63 = vsub.f32 %v2467_v0, %v378_v58  ;;  %v381_v3 = vsub.f32 %v2472_v1, %v378_v58  ;;  %v2303_v0 = vld [vmem:[%s3492_s10 + $0x3] ss:$4 sm:$0xf] }
  0x9c   :  { %v2557_v19 = vrot.slane %v2303_v0, %v2541_v8  ;;  %v2566_v23 = vrot.slane %v2303_v0, %v2543_v9  ;;  %v2569_v25 = vrot.slane %v2303_v0, %v2545_v12  ;;  %v2577_v29 = vrot.slane %v2303_v0, %v50_v13 }
  0x9d   :  { %v369_v35 = vsub.f32 %v364_v32, %v367_v34  ;;  %v134_v32 = vld [vmem:[%s3493_s7] sm:$0xff] }
  0x9e   :  { %v133_v34 = vld [vmem:[%s3494_s6] sm:$0xff] }
  0x9f   :  { %v370_v36 = vmax.f32 %v369_v35, 0.0 }
  0xa1   :  { %v382_v37 = vadd.f32 1e-05, %v370_v36  ;;  %v2602_v36 = vand.u32 127, %v40_v44 }
  0xa3   :  { %2375 = vrsqrt.f32 %v382_v37  ;;  %v2301_v37 = vld [vmem:[%s3492_s10 + $0x1] ss:$4 sm:$0xf]  ;;  %vm451_vm1 = vcmp.lt.s32.totalorder %v2602_v36, 112  ;;  %vm434_vm2 = vcmp.lt.s32.totalorder %v2602_v36, 16  ;;  %vm517_vm4 = vcmp.lt.s32.totalorder %v2602_v36, 127 }
  0xa4   :  { %v2618_v46 = vrot.slane %v2301_v37, %v50_v13  ;;  %vm484_vm5 = vcmp.lt.s32.totalorder %v2602_v36, 1 }
  0xb0   :  { %v2376_v40 = vpop.eup %2375  ;;  %v143_v43 = vpop.xlane.xlu1 %142 }
  0xb1   :  { %v387_v41 = vmul.f32 %v2376_v40, %v385_v39  ;;  %v2534_v47 = vmul.f32 0.001953125, %v143_v43  ;;  %v2609_v40 = vrot.slane %v2301_v37, %v2541_v8  ;;  %v38_v43 = vld [vmem:[%s3492_s10] ss:$4 sm:$0xf]  ;;  %s2396_s10 = smov 1  }
  0xb2   :  { %v2625_v50 = vrot.slane %v38_v43, %v2545_v12  ;;  %v2636_v56 = vrot.slane %v38_v43, %v2541_v8 }
  0xb3   :  { %390 = vperm.xlu0 %2360, %v387_v41   ;;  %v151_v53 = vmul.f32 %v2534_v47, %v2534_v47 }
  0xb4   :  { %v148_v48 = vpop.xlane.xlu1 %147 }
  0xb5   :  { %v150_v54 = vmul.f32 0.001953125, %v148_v48  ;;  %v2621_v48 = vrot.slane %v38_v43, %v2543_v9 }
  0xb7   :  { %v152_v57 = vsub.f32 %v150_v54, %v151_v53 }
  0xb9   :  { %v153_v60 = vmax.f32 %v152_v57, 0.0  ;;  %v2638_v57 = vrot.slane %v38_v43, %v50_v13 }
  0xbb   :  { %v158_v5 = vadd.f32 1e-05, %v153_v60 }
  0xbd   :  { %2377 = vrsqrt.f32 %v158_v5 }
  0xca   :  { %v2378_v33 = vpop.eup %2377 }
  0xcb   :  { %v160_v35 = vmul.f32 %v2378_v33, %v133_v34 }
 0x12e   :  { %v391_v61 = vpop.permute.xlu0 %390 }
 0x12f   :  { %v398_v4 = vrot.slane %v391_v61, %v397_v59 }
 0x131   :  { %v400_v10 = vmul.f32 %v398_v4, %v380_v63  ;;  %v401_v11 = vmul.f32 %v398_v4, %v381_v3 }
 0x133   :  { %v414_v1 = vadd.f32 %v412_v62, %v400_v10  ;;  %v415_v15 = vadd.f32 %v412_v62, %v401_v11  ;;  %v2655_v10 = vrot.slane %v2301_v37, %v2543_v9  ;;  %v2658_v11 = vrot.slane %v2301_v37, %v2545_v12 }
 0x135   :  { %v2571_v26 = vmax.f32 %v414_v1, 0.0  ;;  %v2573_v27 = vmax.f32 %v415_v15, 0.0 }
 0x137   :  { %428 = vrot.lane.b32.xlu1 %v2573_v27, %s2392_s17  ;;  %447 = vrot.lane.b32.xlu0 %v2573_v27, %s2393_s18  ;;  %v420_v30 = vcombine.high %v2571_v26, %v2571_v26  ;;  %v421_v31 = vcombine.high %v2573_v27, %v2573_v27  ;;  %v461_v3 = vcombine.low %v2573_v27, %v2573_v27 }
 0x138   :  { %v460_v4 = vcombine.low %v2571_v26, %v2571_v26 }
 0x13b   :  { %424 = vrot.lane.b32.xlu0 %v2571_v26, %s2392_s17  ;;  %445 = vrot.lane.b32.xlu1 %v420_v30, %s2393_s18 }
 0x13f   :  { %449 = vrot.lane.b32.xlu0 %v421_v31, %s2393_s18  ;;  %430 = vrot.lane.b32.xlu1 %v421_v31, %s2392_s17 }
 0x143   :  { %426 = vrot.lane.b32.xlu0 %v420_v30, %s2392_s17  ;;  %172 = vperm.xlu1 %2361, %v134_v32  }
 0x147   :  { %443 = vrot.lane.b32.xlu0 %v2571_v26, %s2393_s18 }
 0x14b   :  { %163 = vperm.xlu0 %2360, %v160_v35  }
 0x1a9   :  { %v429_v38 = vpop.permute.xlu1 %428  ;;  %v448_v39 = vpop.permute.xlu0 %447 }
 0x1ad   :  { %v425_v41 = vpop.permute.xlu0 %424  ;;  %v446_v42 = vpop.permute.xlu1 %445 }
 0x1ae   :  { %v453_v44 = vsel %vm451_vm1, %v446_v42, %v448_v39 }
 0x1af   :  { %v457_v45 = vmul.f32 %v453_v44, %v2609_v40  ;;  %v155_v44 = vsub.f32 %v2507_v18, %v2534_v47 }
 0x1b1   :  { %v450_v49 = vpop.permute.xlu0 %449  ;;  %507 = vrot.lane.b32.xlu0 %v457_v45, %s2394_s27  ;;  %v431_v51 = vpop.permute.xlu1 %430  ;;  %v548_v14 = vrot.slane %v457_v45, 4 }
 0x1b2   :  { %v452_v52 = vsel %vm451_vm1, %v448_v39, %v450_v49  ;;  %v435_v53 = vsel %vm434_vm2, %v429_v38, %v431_v51  ;;  %v438_v54 = vsel %vm434_vm2, %v431_v51, %v425_v41  ;;  %v154_v51 = vsub.f32 %v2502_v17, %v2534_v47 }
 0x1b3   :  { %v458_v58 = vmul.f32 %v452_v52, %v2618_v46  ;;  %v439_v59 = vmul.f32 %v438_v54, %v2621_v48  ;;  %v442_v60 = vmul.f32 %v435_v53, %v2625_v50  ;;  %v156_v52 = vsub.f32 %v2514_v20, %v2534_v47 }
 0x1b5   :  { %v427_v61 = vpop.permute.xlu0 %426  ;;  %511 = vrot.lane.b32.xlu1 %v458_v58, %s2394_s27  ;;  %v2661_v13 = vsel %vm354_vm0, %v439_v59, %v460_v4  ;;  %v2672_v30 = vsel %vm354_vm0, %v442_v60, %v2573_v27  ;;  %v550_v9 = vrot.slane %v458_v58, 4 }
 0x1b6   :  { %v436_v62 = vsel %vm434_vm2, %v427_v61, %v429_v38  ;;  %v437_v63 = vsel %vm434_vm2, %v425_v41, %v427_v61  ;;  %v542_v37 = vrot.slane %v2661_v13, 4  ;;  %v545_v38 = vrot.slane %v2672_v30, 4 }
 0x1b7   :  { %v440_v5 = vmul.f32 %v437_v63, %v2636_v56  ;;  %v441_v8 = vmul.f32 %v436_v62, %v2638_v57 }
 0x1b9   :  { %v444_v0 = vpop.permute.xlu0 %443  ;;  %v2665_v1 = vsel %vm354_vm0, %v440_v5, %v2571_v26  ;;  %v2668_v15 = vsel %vm354_vm0, %v441_v8, %v461_v3 }
 0x1ba   :  { %v454_v12 = vsel %vm451_vm1, %v444_v0, %v446_v42  ;;  %v455_v31 = vsel %vm451_vm1, %v450_v49, %v444_v0  ;;  %v543_v32 = vrot.slane %v2665_v1, 4  ;;  %v544_v33 = vrot.slane %v2668_v15, 4 }
 0x1bb   :  { %v456_v26 = vmul.f32 %v454_v12, %v2655_v10  ;;  %v459_v34 = vmul.f32 %v455_v31, %v2658_v11  ;;  %v157_v49 = vsub.f32 %v2524_v24, %v2534_v47  ;;  %v183_v47 = vld [vmem:[%s3495_s8] sm:$0xf] }
 0x1bc   :  { %v2685_v27 = vsel %vm354_vm0, %v543_v32, %v548_v14  ;;  %v2690_v35 = vsel %vm354_vm0, %v544_v33, %v550_v9 }
 0x1bd   :  { %470 = vrot.lane.b32.xlu1 %v456_v26, %s2396_s10  ;;  %503 = vrot.lane.b32.xlu0 %v456_v26, %s2394_s27  ;;  %v546_v39 = vrot.slane %v456_v26, 4  ;;  %v552_v41 = vrot.slane %v459_v34, 4 }
 0x1be   :  { %v173_v18 = vpop.permute.xlu1 %172 }
 0x1bf   :  { %v2699_v42 = vsel %vm354_vm0, %v542_v37, %v546_v39  ;;  %v2704_v43 = vsel %vm354_vm0, %v545_v38, %v552_v41 }
 0x1c1   :  { %482 = vrot.lane.b32.xlu1 %v459_v34, %s2396_s10  ;;  %515 = vrot.lane.b32.xlu0 %v459_v34, %s2394_s27 }
 0x1c5   :  { %505 = vrot.lane.b32.xlu1 %v2665_v1, %s2394_s27  ;;  %474 = vrot.lane.b32.xlu0 %v457_v45, %s2396_s10 }
 0x1c6   :  { %v164_v53 = vpop.permute.xlu0 %163 }
 0x1c7   :  { %v167_v54 = vmul.f32 %v164_v53, %v155_v44  ;;  %v169_v59 = vmul.f32 %v164_v53, %v157_v49  ;;  %v166_v60 = vmul.f32 %v164_v53, %v154_v51  ;;  %v168_v61 = vmul.f32 %v164_v53, %v156_v52 }
 0x1c9   :  { %509 = vrot.lane.b32.xlu0 %v2668_v15, %s2394_s27  ;;  %501 = vrot.lane.b32.xlu1 %v2661_v13, %s2394_s27  ;;  %v176_v45 = vadd.f32 %v173_v18, %v167_v54  ;;  %v178_v24 = vadd.f32 %v173_v18, %v169_v59  ;;  %v175_v62 = vadd.f32 %v173_v18, %v166_v60 }
 0x1ca   :  { %v177_v63 = vadd.f32 %v173_v18, %v168_v61 }
 0x1cb   :  { %v180_v17 = vmax.f32 %v176_v45, 0.0  ;;  %v182_v3 = vmax.f32 %v178_v24, 0.0  ;;  %v179_v4 = vmax.f32 %v175_v62, 0.0 }
 0x1cc   :  { %v181_v20 = vmax.f32 %v177_v63, 0.0 }
 0x1cd   :  { %478 = vrot.lane.b32.xlu1 %v458_v58, %s2396_s10  ;;  %513 = vrot.lane.b32.xlu0 %v2672_v30, %s2394_s27  ;;  %v2742_v58 = vld [vmem:[%s3496_s5] sm:$0xf] }
 0x1ce   :  { %224 = vmatprep.subr.mxu0 %v180_v17  ;;  %295 = vmatprep.subr.mxu1 %v182_v3 }
 0x1cf   :  { %225 = vmatpush1.msra.mxu0 %v179_v4  ;;  %296 = vmatpush1.msra.mxu1 %v181_v20 }
 0x1d0   :  { %2304 = vmatmul.mubr.msk.f32.vlgmr.msra.gmra.mxu0 %vm190_vm3, %v183_v47  ;;  %2305 = vmatmul.mubr.msk.f32.vlgmr.msra.gmra.mxu1 %vm190_vm3, %v183_v47 }
 0x1d1   :  { %468 = vrot.lane.b32.xlu1 %v2661_v13, %s2396_s10  ;;  %472 = vrot.lane.b32.xlu0 %v2665_v1, %s2396_s10 }
 0x1d2   :  { %653 = vmatprep.mubr.f32.mxu0 %v2395_v55  ;;  %724 = vmatprep.mubr.f32.mxu1 %v2395_v55 }
 0x1d5   :  { %476 = vrot.lane.b32.xlu1 %v2668_v15, %s2396_s10  ;;  %480 = vrot.lane.b32.xlu0 %v2672_v30, %s2396_s10  ;;  %v566_v15 = vld [vmem:[%s3497_s4] sm:$0xf] }
 0x1d9   :  { %570 = vperm.xlu0 %2360, %v2742_v58  }
 0x223   :  { %v508_v5 = vpop.permute.xlu0 %507 }
 0x227   :  { %v512_v8 = vpop.permute.xlu1 %511 }
 0x228   :  { %v521_v14 = vsel %vm517_vm4, %v508_v5, %v512_v8 }
 0x229   :  { %v531_v0 = vmul.f32 %v521_v14, %v2557_v19 }
 0x22b   :  { %2306 = vmatprep.subr.msk.mxu0 %vm354_vm0, %v531_v0 }
 0x22f   :  { %v504_v9 = vpop.permute.xlu0 %503  ;;  %v471_v12 = vpop.permute.xlu1 %470 }
 0x230   :  { %v523_v31 = vsel %vm517_vm4, %v504_v9, %v508_v5 }
 0x231   :  { %v530_v26 = vmul.f32 %v523_v31, %v2566_v23 }
 0x233   :  { %v516_v34 = vpop.permute.xlu0 %515  ;;  %2307 = vmatpush1.msk.msra.mxu0 %vm354_vm0, %v530_v26  ;;  %v483_v39 = vpop.permute.xlu1 %482 }
 0x234   :  { %v519_v41 = vsel %vm517_vm4, %v512_v8, %v516_v34  ;;  %v525_v44 = vsel %vm517_vm4, %v516_v34, %v504_v9  ;;  %v492_v61 = vsel %vm484_vm5, %v483_v39, %v471_v12 }
 0x235   :  { %v532_v49 = vmul.f32 %v519_v41, %v2577_v29  ;;  %v533_v51 = vmul.f32 %v525_v44, %v2569_v25  ;;  %v497_v17 = vmul.f32 %v492_v61, %v2560_v21 }
 0x237   :  { %v475_v52 = vpop.permute.xlu0 %474  ;;  %2309 = vmatprep.subr.msk.mxu1 %vm354_vm0, %v533_v51  ;;  %v506_v53 = vpop.permute.xlu1 %505 }
 0x238   :  { %2310 = vmatpush1.msk.msra.mxu1 %vm354_vm0, %v532_v49  ;;  %v490_v54 = vsel %vm484_vm5, %v471_v12, %v475_v52 }
 0x239   :  { %v498_v63 = vmul.f32 %v490_v54, %v2554_v16 }
 0x23b   :  { %v510_v59 = vpop.permute.xlu0 %509  ;;  %v502_v60 = vpop.permute.xlu1 %501  ;;  %v563_v12 = vsel %vm354_vm0, %v498_v63, %v543_v32 }
 0x23c   :  { %v520_v18 = vsel %vm517_vm4, %v506_v53, %v510_v59  ;;  %v522_v45 = vsel %vm517_vm4, %v502_v60, %v506_v53 }
 0x23d   :  { %v526_v24 = vmul.f32 %v522_v45, %v2566_v23  ;;  %v527_v62 = vmul.f32 %v520_v18, %v2557_v19 }
 0x23f   :  { %v514_v3 = vpop.permute.xlu0 %513  ;;  %613 = vmatprep.subr.mxu0 %v527_v62  ;;  %v479_v4 = vpop.permute.xlu1 %478 }
 0x240   :  { %v518_v20 = vsel %vm517_vm4, %v510_v59, %v514_v3  ;;  %v524_v47 = vsel %vm517_vm4, %v514_v3, %v502_v60  ;;  %v486_v5 = vsel %vm484_vm5, %v479_v4, %v483_v39  ;;  %v488_v8 = vsel %vm484_vm5, %v475_v52, %v479_v4  ;;  %614 = vmatpush1.msra.mxu0 %v526_v24 }
 0x241   :  { %v528_v14 = vmul.f32 %v518_v20, %v2577_v29  ;;  %615 = vmatprep.subr.mxu0 %v2685_v27  ;;  %v529_v0 = vmul.f32 %v524_v47, %v2569_v25  ;;  %v500_v9 = vmul.f32 %v486_v5, %v2563_v22  ;;  %v499_v31 = vmul.f32 %v488_v8, %v2575_v28 }
 0x242   :  { %616 = vmatpush1.msra.mxu0 %v2699_v42  ;;  %v562_v27 = vsel %vm354_vm0, %v497_v17, %v542_v37 }
 0x243   :  { %v473_v26 = vpop.permute.xlu0 %472  ;;  %617 = vmatprep.subr.mxu0 %v563_v12  ;;  %684 = vmatprep.subr.mxu1 %v529_v0  ;;  %v469_v34 = vpop.permute.xlu1 %468  ;;  %v565_v1 = vsel %vm354_vm0, %v500_v9, %v545_v38  ;;  %v564_v37 = vsel %vm354_vm0, %v499_v31, %v544_v33  ;;  %v731_v33 = vld [vmem:[%s3491_s2] sm:$0xf] }
 0x244   :  { %v489_v39 = vsel %vm484_vm5, %v469_v34, %v473_v26  ;;  %618 = vmatpush1.msra.mxu0 %v562_v27  ;;  %685 = vmatpush1.msra.mxu1 %v528_v14  ;;  %v772_v49 = vrot.slane %v731_v33, 4 }
 0x245   :  { %v494_v42 = vmul.f32 %v489_v39, %v2554_v16  ;;  %686 = vmatprep.subr.mxu1 %v2704_v43 }
 0x246   :  { %687 = vmatpush1.msra.mxu1 %v2690_v35  ;;  %773 = vrot.lane.b32.xlu0 %v772_v49, %s2394_s27 }
 0x247   :  { %v481_v32 = vpop.permute.xlu0 %480  ;;  %619 = vmatprep.subr.mxu0 %v494_v42  ;;  %688 = vmatprep.subr.mxu1 %v565_v1  ;;  %v477_v13 = vpop.permute.xlu1 %476  ;;  %v2397_v42 = vmov 1  }
 0x248   :  { %v491_v41 = vsel %vm484_vm5, %v481_v32, %v469_v34  ;;  %v485_v43 = vsel %vm484_vm5, %v477_v13, %v481_v32  ;;  %v487_v35 = vsel %vm484_vm5, %v473_v26, %v477_v13  ;;  %689 = vmatpush1.msra.mxu1 %v564_v37  ;;  %2363 = vset.pattern.permute.xlu1 %v2397_v42 }
 0x249   :  { %v493_v30 = vmul.f32 %v491_v41, %v2560_v21  ;;  %v495_v38 = vmul.f32 %v487_v35, %v2575_v28  ;;  %v496_v44 = vmul.f32 %v485_v43, %v2563_v22 }
 0x24b   :  { %620 = vmatpush1.msra.mxu0 %v493_v30  ;;  %690 = vmatprep.subr.mxu1 %v496_v44 }
 0x24c   :  { %2308 = vmatmul.mubr.msk.f32.vlgmr.msra.gmra.mxu0 %vm573_vm6, %v566_v15  ;;  %691 = vmatpush1.msra.mxu1 %v495_v38 }
 0x24d   :  { %2311 = vmatmul.mubr.msk.f32.vlgmr.msra.gmra.mxu1 %vm573_vm6, %v566_v15  ;;  %1029 = vmatprep.mubr.f32.mxu0 %v2395_v55  ;;  %v732_v15 = vld [vmem:[%s3489_s3] sm:$0xf] }
 0x24e   :  { %1100 = vmatprep.mubr.f32.mxu1 %v2395_v55 }
 0x254   :  { %v571_v59 = vpop.permute.xlu0 %570 }
 0x290   :  { %v2826_v51 = vpop.f32.mrf.mxu0  ;;  %v2828_v52 = vpop.f32.mrf.mxu1 }
 0x292   :  { %v2830_v53 = vpop.f32.mrf.mxu0  ;;  %v2832_v54 = vpop.f32.mrf.mxu1 }
 0x2b8   :  { %v774_v30 = vpop.permute.xlu0 %773 }
 0x30c   :  { %v655_v60 = vpop.f32.mrf.mxu0 }
 0x30d   :  { %v656_v61 = vadd.f32 %v655_v60, %v571_v59  ;;  %v726_v18 = vpop.f32.mrf.mxu1 }
 0x30e   :  { %v727_v45 = vadd.f32 %v726_v18, %v571_v59  ;;  %v657_v24 = vpop.f32.mrf.mxu0 }
 0x30f   :  { %v733_v62 = vmul.f32 %v656_v61, %v656_v61  ;;  %v658_v63 = vadd.f32 %v657_v24, %v571_v59  ;;  %v728_v17 = vpop.f32.mrf.mxu1 }
 0x310   :  { %v735_v3 = vmul.f32 %v727_v45, %v727_v45  ;;  %v729_v4 = vadd.f32 %v728_v17, %v571_v59 }
 0x311   :  { %v741_v20 = vrot.slane %v733_v62, 4  ;;  %v734_v47 = vmul.f32 %v658_v63, %v658_v63 }
 0x312   :  { %v736_v5 = vmul.f32 %v729_v4, %v729_v4  ;;  %v743_v8 = vrot.slane %v735_v3, 4 }
 0x313   :  { %v742_v14 = vrot.slane %v734_v47, 4  ;;  %v749_v0 = vsel %vm354_vm0, %v656_v61, %v741_v20 }
 0x314   :  { %v744_v12 = vrot.slane %v736_v5, 4  ;;  %v751_v26 = vsel %vm354_vm0, %v727_v45, %v743_v8 }
 0x315   :  { %v750_v9 = vsel %vm354_vm0, %v658_v63, %v742_v14 }
 0x316   :  { %v753_v31 = vadd.f32 %v750_v9, %v749_v0  ;;  %v752_v27 = vsel %vm354_vm0, %v729_v4, %v744_v12 }
 0x318   :  { %v754_v34 = vadd.f32 %v753_v31, %v751_v26 }
 0x31a   :  { %v755_v39 = vadd.f32 %v754_v34, %v752_v27 }
 0x31c   :  { %756 = vadd.xlane.f32.xlu1 %v755_v39 }
 0x3a5   :  { %v757_v1 = vpop.xlane.xlu1 %756 }
 0x3a6   :  { %v758_v32 = vmul.f32 0.001953125, %v757_v1 }
 0x3a8   :  { %v759_v13 = vmul.f32 %v758_v32, %v758_v32  ;;  %v767_v59 = vsub.f32 %v727_v45, %v758_v32  ;;  %v766_v60 = vsub.f32 %v658_v63, %v758_v32  ;;  %v768_v20 = vsub.f32 %v729_v4, %v758_v32 }
 0x3a9   :  { %v765_v14 = vsub.f32 %v656_v61, %v758_v32 }
 0x3aa   :  { %v761_v37 = vrot.slane %v759_v13, 4 }
 0x3ac   :  { %v763_v41 = vsub.f32 %v758_v32, %v761_v37 }
 0x3ae   :  { %v764_v43 = vmax.f32 %v763_v41, 0.0 }
 0x3b0   :  { %v769_v35 = vadd.f32 1e-05, %v764_v43 }
 0x3b2   :  { %2379 = vrsqrt.f32 %v769_v35 }
 0x3bf   :  { %v2380_v38 = vpop.eup %2379 }
 0x3c0   :  { %v776_v44 = vmul.f32 %v2380_v38, %v774_v30 }
 0x3c2   :  { %779 = vperm.xlu0 %2360, %v776_v44  }
 0x3c6   :  { %2362 = vset.pattern.permute.xlu0 %v2397_v42 }
 0x3c7   :  { %789 = vperm.xlu0 %2362, %v732_v15  }
 0x43d   :  { %v780_v33 = vpop.permute.xlu0 %779 }
 0x43e   :  { %v781_v49 = vrot.slane %v780_v33, 4 }
 0x440   :  { %v785_v18 = vmul.f32 %v781_v49, %v767_v59  ;;  %v784_v24 = vmul.f32 %v781_v49, %v766_v60  ;;  %v786_v8 = vmul.f32 %v781_v49, %v768_v20  ;;  %v783_v9 = vmul.f32 %v781_v49, %v765_v14 }
 0x442   :  { %v790_v62 = vpop.permute.xlu0 %789 }
 0x443   :  { %v794_v17 = vadd.f32 %v790_v62, %v785_v18  ;;  %v793_v3 = vadd.f32 %v790_v62, %v784_v24  ;;  %v795_v0 = vadd.f32 %v790_v62, %v786_v8  ;;  %v792_v63 = vadd.f32 %v790_v62, %v783_v9 }
 0x445   :  { %v798_v47 = vmax.f32 %v794_v17, 0.0  ;;  %v797_v5 = vmax.f32 %v793_v3, 0.0  ;;  %v799_v45 = vmax.f32 %v795_v0, 0.0  ;;  %v796_v12 = vmax.f32 %v792_v63, 0.0 }
 0x447   :  { %804 = vrot.lane.b32.xlu1 %v798_v47, %s2392_s17  ;;  %818 = vrot.lane.b32.xlu0 %v797_v5, %s2393_s18  ;;  %v837_v35 = vrot.slane %v797_v5, 4  ;;  %v838_v30 = vrot.slane %v798_v47, 4  ;;  %v836_v9 = vrot.slane %v796_v12, 4  ;;  %v839_v63 = vrot.slane %v799_v45, 4 }
 0x44b   :  { %820 = vrot.lane.b32.xlu0 %v798_v47, %s2393_s18 }
 0x44f   :  { %822 = vrot.lane.b32.xlu0 %v799_v45, %s2393_s18 }
 0x453   :  { %800 = vrot.lane.b32.xlu0 %v796_v12, %s2392_s17 }
 0x457   :  { %802 = vrot.lane.b32.xlu0 %v797_v5, %s2392_s17 }
 0x45b   :  { %816 = vrot.lane.b32.xlu0 %v796_v12, %s2393_s18 }
 0x45f   :  { %806 = vrot.lane.b32.xlu0 %v799_v45, %s2392_s17 }
 0x4b9   :  { %v819_v4 = vpop.permute.xlu0 %818  ;;  %v805_v1 = vpop.permute.xlu1 %804 }
 0x4bd   :  { %v821_v31 = vpop.permute.xlu0 %820 }
 0x4be   :  { %v825_v61 = vsel %vm451_vm1, %v819_v4, %v821_v31 }
 0x4bf   :  { %v829_v26 = vmul.f32 %v825_v61, %v2609_v40 }
 0x4c1   :  { %v823_v34 = vpop.permute.xlu0 %822  ;;  %886 = vrot.lane.b32.xlu0 %v829_v26, %s2394_s27  ;;  %v926_v33 = vrot.slane %v829_v26, 4 }
 0x4c2   :  { %v824_v27 = vsel %vm451_vm1, %v821_v31, %v823_v34 }
 0x4c3   :  { %v830_v39 = vmul.f32 %v824_v27, %v2618_v46 }
 0x4c5   :  { %890 = vrot.lane.b32.xlu0 %v830_v39, %s2394_s27  ;;  %v801_v42 = vpop.permute.xlu0 %800  ;;  %v928_v49 = vrot.slane %v830_v39, 4 }
 0x4c9   :  { %v803_v32 = vpop.permute.xlu0 %802 }
 0x4ca   :  { %v809_v13 = vsel %vm434_vm2, %v803_v32, %v805_v1  ;;  %v810_v37 = vsel %vm434_vm2, %v801_v42, %v803_v32 }
 0x4cb   :  { %v813_v41 = vmul.f32 %v810_v37, %v2636_v56  ;;  %v814_v43 = vmul.f32 %v809_v13, %v2638_v57 }
 0x4cd   :  { %v817_v38 = vpop.permute.xlu0 %816  ;;  %v2864_v44 = vsel %vm354_vm0, %v813_v41, %v837_v35  ;;  %v2867_v15 = vsel %vm354_vm0, %v814_v43, %v838_v30 }
 0x4ce   :  { %v826_v59 = vsel %vm451_vm1, %v817_v38, %v819_v4  ;;  %v921_v60 = vrot.slane %v2864_v44, 4  ;;  %v922_v18 = vrot.slane %v2867_v15, 4  ;;  %v827_v24 = vsel %vm451_vm1, %v823_v34, %v817_v38 }
 0x4cf   :  { %v828_v62 = vmul.f32 %v826_v59, %v2655_v10  ;;  %v831_v47 = vmul.f32 %v827_v24, %v2658_v11 }
 0x4d0   :  { %v2879_v17 = vsel %vm354_vm0, %v921_v60, %v926_v33  ;;  %v2884_v3 = vsel %vm354_vm0, %v922_v18, %v928_v49 }
 0x4d1   :  { %850 = vrot.lane.b32.xlu0 %v828_v62, %s2396_s10  ;;  %882 = vrot.lane.b32.xlu1 %v828_v62, %s2394_s27  ;;  %v807_v20 = vpop.permute.xlu0 %806  ;;  %v924_v61 = vrot.slane %v828_v62, 4 }
 0x4d2   :  { %v808_v5 = vsel %vm434_vm2, %v805_v1, %v807_v20  ;;  %v811_v8 = vsel %vm434_vm2, %v807_v20, %v801_v42  ;;  %v930_v42 = vrot.slane %v831_v47, 4 }
 0x4d3   :  { %v812_v14 = vmul.f32 %v811_v8, %v2621_v48  ;;  %v815_v0 = vmul.f32 %v808_v5, %v2625_v50 }
 0x4d5   :  { %862 = vrot.lane.b32.xlu0 %v831_v47, %s2396_s10  ;;  %894 = vrot.lane.b32.xlu1 %v831_v47, %s2394_s27  ;;  %v2898_v4 = vsel %vm354_vm0, %v812_v14, %v836_v9  ;;  %v2901_v31 = vsel %vm354_vm0, %v815_v0, %v839_v63 }
 0x4d6   :  { %v920_v34 = vrot.slane %v2898_v4, 4  ;;  %v923_v27 = vrot.slane %v2901_v31, 4 }
 0x4d8   :  { %v925_v45 = vsel %vm354_vm0, %v920_v34, %v924_v61  ;;  %v2911_v12 = vsel %vm354_vm0, %v923_v27, %v930_v42 }
 0x4d9   :  { %884 = vrot.lane.b32.xlu0 %v2864_v44, %s2394_s27  ;;  %854 = vrot.lane.b32.xlu1 %v829_v26, %s2396_s10 }
 0x4dd   :  { %888 = vrot.lane.b32.xlu1 %v2867_v15, %s2394_s27  ;;  %880 = vrot.lane.b32.xlu0 %v2898_v4, %s2394_s27 }
 0x4e1   :  { %892 = vrot.lane.b32.xlu1 %v2901_v31, %s2394_s27  ;;  %858 = vrot.lane.b32.xlu0 %v830_v39, %s2396_s10 }
 0x4e5   :  { %852 = vrot.lane.b32.xlu1 %v2864_v44, %s2396_s10  ;;  %848 = vrot.lane.b32.xlu0 %v2898_v4, %s2396_s10 }
 0x4e9   :  { %860 = vrot.lane.b32.xlu1 %v2901_v31, %s2396_s10  ;;  %856 = vrot.lane.b32.xlu0 %v2867_v15, %s2396_s10  ;;  %v2312_v15 = vld [vmem:[%s3497_s4 + $0x4] sm:$0xf] }
 0x4ed   :  { %947 = vperm.xlu1 %2363, %v2742_v58  }
 0x4f1   :  { %2364 = vset.pattern.permute.xlu1 %v2389_v2 }
 0x533   :  { %v887_v26 = vpop.permute.xlu0 %886 }
 0x537   :  { %v891_v1 = vpop.permute.xlu0 %890 }
 0x538   :  { %v899_v39 = vsel %vm517_vm4, %v887_v26, %v891_v1 }
 0x539   :  { %v909_v32 = vmul.f32 %v899_v39, %v2557_v19 }
 0x53b   :  { %2313 = vmatprep.subr.msk.mxu0 %vm354_vm0, %v909_v32 }
 0x543   :  { %v883_v13 = vpop.permute.xlu1 %882  ;;  %v851_v37 = vpop.permute.xlu0 %850 }
 0x544   :  { %v901_v41 = vsel %vm517_vm4, %v883_v13, %v887_v26 }
 0x545   :  { %v908_v43 = vmul.f32 %v901_v41, %v2566_v23 }
 0x547   :  { %v895_v35 = vpop.permute.xlu1 %894  ;;  %2314 = vmatpush1.msk.msra.mxu0 %vm354_vm0, %v908_v43  ;;  %v863_v58 = vpop.permute.xlu0 %862 }
 0x548   :  { %v897_v30 = vsel %vm517_vm4, %v891_v1, %v895_v35  ;;  %v903_v38 = vsel %vm517_vm4, %v895_v35, %v883_v13  ;;  %v871_v5 = vsel %vm484_vm5, %v863_v58, %v851_v37 }
 0x549   :  { %v910_v33 = vmul.f32 %v897_v30, %v2577_v29  ;;  %v911_v49 = vmul.f32 %v903_v38, %v2569_v25  ;;  %v876_v61 = vmul.f32 %v871_v5, %v2560_v21 }
 0x54b   :  { %2316 = vmatprep.subr.msk.mxu1 %vm354_vm0, %v911_v49  ;;  %v855_v59 = vpop.permute.xlu1 %854  ;;  %v885_v24 = vpop.permute.xlu0 %884 }
 0x54c   :  { %2317 = vmatpush1.msk.msra.mxu1 %vm354_vm0, %v910_v33  ;;  %v869_v62 = vsel %vm484_vm5, %v851_v37, %v855_v59  ;;  %v940_v33 = vsel %vm354_vm0, %v876_v61, %v920_v34 }
 0x54d   :  { %v877_v63 = vmul.f32 %v869_v62, %v2554_v16 }
 0x54f   :  { %v889_v20 = vpop.permute.xlu1 %888  ;;  %v881_v47 = vpop.permute.xlu0 %880  ;;  %v941_v35 = vsel %vm354_vm0, %v877_v63, %v921_v60 }
 0x550   :  { %v898_v8 = vsel %vm517_vm4, %v885_v24, %v889_v20  ;;  %v900_v14 = vsel %vm517_vm4, %v881_v47, %v885_v24 }
 0x551   :  { %v905_v0 = vmul.f32 %v898_v8, %v2557_v19  ;;  %v904_v9 = vmul.f32 %v900_v14, %v2566_v23 }
 0x553   :  { %v893_v42 = vpop.permute.xlu1 %892  ;;  %989 = vmatprep.subr.mxu0 %v905_v0  ;;  %v859_v26 = vpop.permute.xlu0 %858  ;;  %v2387_v0 = vld [vmem:[%s3488_s0] sm:$0xff] }
 0x554   :  { %v896_v1 = vsel %vm517_vm4, %v889_v20, %v893_v42  ;;  %v902_v39 = vsel %vm517_vm4, %v893_v42, %v881_v47  ;;  %v865_v32 = vsel %vm484_vm5, %v859_v26, %v863_v58  ;;  %v867_v13 = vsel %vm484_vm5, %v855_v59, %v859_v26  ;;  %990 = vmatpush1.msra.mxu0 %v904_v9  ;;  %v2388_v42 = vld [vmem:[%s3488_s0 + $0x8] sm:$0xff] }
 0x555   :  { %v906_v37 = vmul.f32 %v896_v1, %v2577_v29  ;;  %v907_v41 = vmul.f32 %v902_v39, %v2569_v25  ;;  %991 = vmatprep.subr.mxu0 %v2879_v17  ;;  %v879_v43 = vmul.f32 %v865_v32, %v2563_v22  ;;  %v878_v30 = vmul.f32 %v867_v13, %v2575_v28 }
 0x556   :  { %992 = vmatpush1.msra.mxu0 %v925_v45 }
 0x557   :  { %v853_v58 = vpop.permute.xlu1 %852  ;;  %1060 = vmatprep.subr.mxu1 %v907_v41  ;;  %v849_v38 = vpop.permute.xlu0 %848  ;;  %993 = vmatprep.subr.mxu0 %v941_v35  ;;  %v943_v44 = vsel %vm354_vm0, %v879_v43, %v923_v27  ;;  %v942_v34 = vsel %vm354_vm0, %v878_v30, %v922_v18  ;;  %v3010_v18 = vld [vmem:[%s3491_s2] sm:$0xf] }
 0x558   :  { %v868_v17 = vsel %vm484_vm5, %v849_v38, %v853_v58  ;;  %994 = vmatpush1.msra.mxu0 %v940_v33  ;;  %1061 = vmatpush1.msra.mxu1 %v906_v37  ;;  %v1346_v24 = vrot.slane %v3010_v18, 4 }
 0x559   :  { %v873_v45 = vmul.f32 %v868_v17, %v2554_v16  ;;  %1062 = vmatprep.subr.mxu1 %v2911_v12 }
 0x55a   :  { %1063 = vmatpush1.msra.mxu1 %v2884_v3  ;;  %1347 = vrot.lane.b32.xlu1 %v1346_v24, %s2398_s24 }
 0x55b   :  { %v861_v60 = vpop.permute.xlu1 %860  ;;  %1064 = vmatprep.subr.mxu1 %v943_v44  ;;  %v857_v4 = vpop.permute.xlu0 %856  ;;  %995 = vmatprep.subr.mxu0 %v873_v45 }
 0x55c   :  { %v870_v49 = vsel %vm484_vm5, %v861_v60, %v849_v38  ;;  %v864_v12 = vsel %vm484_vm5, %v857_v4, %v861_v60  ;;  %v866_v3 = vsel %vm484_vm5, %v853_v58, %v857_v4  ;;  %1065 = vmatpush1.msra.mxu1 %v942_v34  ;;  %v2399_v4 = vmov 2  }
 0x55d   :  { %v872_v31 = vmul.f32 %v870_v49, %v2560_v21  ;;  %v874_v27 = vmul.f32 %v866_v3, %v2575_v28  ;;  %v875_v59 = vmul.f32 %v864_v12, %v2563_v22  ;;  %2367 = vset.pattern.permute.xlu0 %v2399_v4 }
 0x55f   :  { %996 = vmatpush1.msra.mxu0 %v872_v31  ;;  %1066 = vmatprep.subr.mxu1 %v875_v59 }
 0x560   :  { %2315 = vmatmul.mubr.msk.f32.vlgmr.msra.gmra.mxu0 %vm573_vm6, %v2312_v15  ;;  %1067 = vmatpush1.msra.mxu1 %v874_v27 }
 0x561   :  { %2318 = vmatmul.mubr.msk.f32.vlgmr.msra.gmra.mxu1 %vm573_vm6, %v2312_v15  ;;  %1261 = vmatprep.mubr.f32.mxu0 %v2395_v55 }
 0x562   :  { %1332 = vmatprep.mubr.f32.mxu1 %v2395_v55 }
 0x568   :  { %v948_v62 = vpop.permute.xlu1 %947 }
 0x5cc   :  { %v1348_v15 = vpop.permute.xlu1 %1347 }
 0x620   :  { %v1031_v20 = vpop.f32.mrf.mxu0 }
 0x621   :  { %v1032_v47 = vadd.f32 %v1031_v20, %v948_v62  ;;  %v1102_v5 = vpop.f32.mrf.mxu1 }
 0x622   :  { %v1103_v8 = vadd.f32 %v1102_v5, %v948_v62  ;;  %v1033_v14 = vpop.f32.mrf.mxu0 }
 0x623   :  { %v3018_v9 = vadd.f32 %v2387_v0, %v1032_v47  ;;  %v1034_v63 = vadd.f32 %v1033_v14, %v948_v62  ;;  %v1104_v61 = vpop.f32.mrf.mxu1  ;;  %v3050_v47 = vld [vmem:[%s3489_s3] sm:$0xf] }
 0x624   :  { %v3023_v26 = vadd.f32 %v2388_v42, %v1103_v8  ;;  %v1105_v1 = vadd.f32 %v1104_v61, %v948_v62 }
 0x625   :  { %v1113_v39 = vmul.f32 %v3018_v9, %v3018_v9  ;;  %v3028_v32 = vadd.f32 %v1034_v63, %v2485_v6 }
 0x626   :  { %v3031_v13 = vadd.f32 %v1105_v1, %v2489_v7  ;;  %v1115_v37 = vmul.f32 %v3023_v26, %v3023_v26 }
 0x627   :  { %v1114_v41 = vmul.f32 %v3028_v32, %v3028_v32  ;;  %v1121_v43 = vrot.slane %v1113_v39, 4 }
 0x628   :  { %v1116_v35 = vmul.f32 %v3031_v13, %v3031_v13  ;;  %v1123_v58 = vrot.slane %v1115_v37, 4 }
 0x629   :  { %v1122_v30 = vrot.slane %v1114_v41, 4  ;;  %v1129_v6 = vsel %vm354_vm0, %v3018_v9, %v1121_v43 }
 0x62a   :  { %v1124_v38 = vrot.slane %v1116_v35, 4  ;;  %v1131_v17 = vsel %vm354_vm0, %v3023_v26, %v1123_v58 }
 0x62b   :  { %v1130_v7 = vsel %vm354_vm0, %v3028_v32, %v1122_v30 }
 0x62c   :  { %v1133_v33 = vadd.f32 %v1130_v7, %v1129_v6  ;;  %v1132_v44 = vsel %vm354_vm0, %v3031_v13, %v1124_v38 }
 0x62e   :  { %v1134_v45 = vadd.f32 %v1133_v33, %v1131_v17  ;;  %v1111_v17 = vld [vmem:[%s3494_s6 + $0x8] sm:$0xf] }
 0x630   :  { %v1135_v60 = vadd.f32 %v1134_v45, %v1132_v44  ;;  %v1152_v45 = vrot.slane %v1111_v17, 4 }
 0x632   :  { %1136 = vadd.xlane.f32.xlu0 %v1135_v60  ;;  %v1112_v60 = vld [vmem:[%s3493_s7 + $0x8] sm:$0xf] }
 0x6bb   :  { %v1137_v34 = vpop.xlane.xlu0 %1136 }
 0x6bc   :  { %v1138_v49 = vmul.f32 0.001953125, %v1137_v34 }
 0x6be   :  { %v1139_v12 = vmul.f32 %v1138_v49, %v1138_v49  ;;  %v3055_v14 = vsub.f32 %v3023_v26, %v1138_v49  ;;  %v3058_v0 = vsub.f32 %v3028_v32, %v1138_v49  ;;  %v3063_v37 = vsub.f32 %v3031_v13, %v1138_v49 }
 0x6bf   :  { %v3069_v30 = vsub.f32 %v3018_v9, %v1138_v49 }
 0x6c0   :  { %v1141_v3 = vrot.slane %v1139_v12, 4 }
 0x6c2   :  { %v1143_v31 = vsub.f32 %v1138_v49, %v1141_v3 }
 0x6c4   :  { %v1144_v27 = vmax.f32 %v1143_v31, 0.0 }
 0x6c6   :  { %v1149_v59 = vadd.f32 1e-05, %v1144_v27 }
 0x6c8   :  { %2381 = vrsqrt.f32 %v1149_v59 }
 0x6d5   :  { %v2382_v62 = vpop.eup %2381 }
 0x6d6   :  { %v1350_v20 = vmul.f32 %v2382_v62, %v1348_v15  ;;  %v1154_v44 = vmul.f32 %v2382_v62, %v1152_v45 }
 0x6d8   :  { %1353 = vperm.xlu1 %2364, %v1350_v20  }
 0x6dc   :  { %2365 = vset.pattern.permute.xlu1 %v2399_v4  ;;  %v3087_v4 = vld [vmem:[%s3495_s8] sm:$0xf] }
 0x6dd   :  { %1363 = vperm.xlu1 %2365, %v3050_v47  }
 0x6e1   :  { %2366 = vset.pattern.permute.xlu1 %v2389_v2 }
 0x753   :  { %v1354_v5 = vpop.permute.xlu1 %1353 }
 0x754   :  { %v1355_v8 = vrot.slane %v1354_v5, 4 }
 0x756   :  { %v1359_v63 = vmul.f32 %v1355_v8, %v3055_v14  ;;  %v1358_v61 = vmul.f32 %v1355_v8, %v3058_v0  ;;  %v1360_v35 = vmul.f32 %v1355_v8, %v3063_v37  ;;  %v1357_v38 = vmul.f32 %v1355_v8, %v3069_v30 }
 0x758   :  { %v1364_v42 = vpop.permute.xlu1 %1363 }
 0x759   :  { %v1368_v1 = vadd.f32 %v1364_v42, %v1359_v63  ;;  %v1367_v39 = vadd.f32 %v1364_v42, %v1358_v61  ;;  %v1369_v58 = vadd.f32 %v1364_v42, %v1360_v35  ;;  %v1366_v7 = vadd.f32 %v1364_v42, %v1357_v38 }
 0x75b   :  { %v1372_v41 = vmax.f32 %v1368_v1, 0.0  ;;  %v1371_v43 = vmax.f32 %v1367_v39, 0.0  ;;  %v1373_v6 = vmax.f32 %v1369_v58, 0.0  ;;  %v1370_v33 = vmax.f32 %v1366_v7, 0.0 }
 0x75d   :  { %1378 = vrot.lane.b32.xlu0 %v1372_v41, %s2392_s17  ;;  %1392 = vrot.lane.b32.xlu1 %v1371_v43, %s2393_s18  ;;  %v1411_v42 = vrot.slane %v1371_v43, 4  ;;  %v1412_v1 = vrot.slane %v1372_v41, 4 }
 0x761   :  { %1394 = vrot.lane.b32.xlu1 %v1372_v41, %s2393_s18 }
 0x765   :  { %1396 = vrot.lane.b32.xlu1 %v1373_v6, %s2393_s18 }
 0x769   :  { %1374 = vrot.lane.b32.xlu1 %v1370_v33, %s2392_s17 }
 0x76d   :  { %1376 = vrot.lane.b32.xlu1 %v1371_v43, %s2392_s17 }
 0x771   :  { %1390 = vrot.lane.b32.xlu1 %v1370_v33, %s2393_s18 }
 0x775   :  { %1380 = vrot.lane.b32.xlu1 %v1373_v6, %s2392_s17 }
 0x779   :  { %1157 = vperm.xlu1 %2366, %v1154_v44  }
 0x77d   :  { %1167 = vperm.xlu1 %2366, %v1112_v60  }
 0x781   :  { %1180 = vrot.lane.b32.xlu1 %v3087_v4, %s2400_s15 }
 0x7cf   :  { %v1393_v34 = vpop.permute.xlu1 %1392  ;;  %v1379_v62 = vpop.permute.xlu0 %1378 }
 0x7d3   :  { %v1395_v49 = vpop.permute.xlu1 %1394 }
 0x7d4   :  { %v1399_v12 = vsel %vm451_vm1, %v1393_v34, %v1395_v49 }
 0x7d5   :  { %v1403_v3 = vmul.f32 %v1399_v12, %v2609_v40 }
 0x7d7   :  { %v1397_v31 = vpop.permute.xlu1 %1396  ;;  %1460 = vrot.lane.b32.xlu1 %v1403_v3, %s2394_s27  ;;  %v1500_v7 = vrot.slane %v1403_v3, 4 }
 0x7d8   :  { %v1398_v27 = vsel %vm451_vm1, %v1395_v49, %v1397_v31 }
 0x7d9   :  { %v1404_v59 = vmul.f32 %v1398_v27, %v2618_v46 }
 0x7db   :  { %1464 = vrot.lane.b32.xlu0 %v1404_v59, %s2394_s27  ;;  %v1375_v15 = vpop.permute.xlu1 %1374  ;;  %v1502_v39 = vrot.slane %v1404_v59, 4 }
 0x7df   :  { %v1377_v20 = vpop.permute.xlu1 %1376 }
 0x7e0   :  { %v1383_v5 = vsel %vm434_vm2, %v1377_v20, %v1379_v62  ;;  %v1384_v8 = vsel %vm434_vm2, %v1375_v15, %v1377_v20 }
 0x7e1   :  { %v1387_v63 = vmul.f32 %v1384_v8, %v2636_v56  ;;  %v1388_v61 = vmul.f32 %v1383_v5, %v2638_v57  ;;  %v1410_v8 = vrot.slane %v1370_v33, 4 }
 0x7e3   :  { %v1391_v35 = vpop.permute.xlu1 %1390  ;;  %v3105_v58 = vsel %vm354_vm0, %v1387_v63, %v1411_v42  ;;  %v3108_v38 = vsel %vm354_vm0, %v1388_v61, %v1412_v1  ;;  %v1413_v63 = vrot.slane %v1373_v6, 4 }
 0x7e4   :  { %v1400_v17 = vsel %vm451_vm1, %v1391_v35, %v1393_v34  ;;  %v1401_v45 = vsel %vm451_vm1, %v1397_v31, %v1391_v35  ;;  %v1495_v44 = vrot.slane %v3105_v58, 4  ;;  %v1496_v43 = vrot.slane %v3108_v38, 4 }
 0x7e5   :  { %v1402_v41 = vmul.f32 %v1400_v17, %v2655_v10  ;;  %v1405_v60 = vmul.f32 %v1401_v45, %v2658_v11 }
 0x7e6   :  { %v3121_v49 = vsel %vm354_vm0, %v1495_v44, %v1500_v7  ;;  %v3126_v34 = vsel %vm354_vm0, %v1496_v43, %v1502_v39 }
 0x7e7   :  { %1468 = vrot.lane.b32.xlu0 %v1405_v60, %s2394_s27  ;;  %v1381_v12 = vpop.permute.xlu1 %1380  ;;  %1456 = vrot.lane.b32.xlu1 %v1402_v41, %s2394_s27  ;;  %v1504_v39 = vrot.slane %v1405_v60, 4 }
 0x7e8   :  { %v1382_v31 = vsel %vm434_vm2, %v1379_v62, %v1381_v12  ;;  %v1385_v27 = vsel %vm434_vm2, %v1381_v12, %v1375_v15  ;;  %v1498_v62 = vrot.slane %v1402_v41, 4 }
 0x7e9   :  { %v1386_v20 = vmul.f32 %v1385_v27, %v2621_v48  ;;  %v1389_v5 = vmul.f32 %v1382_v31, %v2625_v50 }
 0x7eb   :  { %1428 = vrot.lane.b32.xlu0 %v1403_v3, %s2396_s10  ;;  %1424 = vrot.lane.b32.xlu1 %v1402_v41, %s2396_s10  ;;  %v3139_v61 = vsel %vm354_vm0, %v1386_v20, %v1410_v8  ;;  %v3142_v42 = vsel %vm354_vm0, %v1389_v5, %v1413_v63 }
 0x7ec   :  { %v1494_v1 = vrot.slane %v3139_v61, 4  ;;  %v1497_v15 = vrot.slane %v3142_v42, 4 }
 0x7ee   :  { %v3149_v6 = vsel %vm354_vm0, %v1494_v1, %v1498_v62  ;;  %v3154_v33 = vsel %vm354_vm0, %v1497_v15, %v1504_v39 }
 0x7ef   :  { %1458 = vrot.lane.b32.xlu0 %v3105_v58, %s2394_s27  ;;  %1436 = vrot.lane.b32.xlu1 %v1405_v60, %s2396_s10 }
 0x7f3   :  { %1454 = vrot.lane.b32.xlu0 %v3139_v61, %s2394_s27  ;;  %1462 = vrot.lane.b32.xlu1 %v3108_v38, %s2394_s27 }
 0x7f4   :  { %v1158_v3 = vpop.permute.xlu1 %1157 }
 0x7f5   :  { %v1159_v35 = vrot.slane %v1158_v3, 4 }
 0x7f7   :  { %1466 = vrot.lane.b32.xlu0 %v3142_v42, %s2394_s27  ;;  %1432 = vrot.lane.b32.xlu1 %v1404_v59, %s2396_s10  ;;  %v1161_v7 = vmul.f32 %v1159_v35, %v3069_v30  ;;  %v1162_v17 = vmul.f32 %v1159_v35, %v3058_v0  ;;  %v1163_v45 = vmul.f32 %v1159_v35, %v3055_v14  ;;  %v3186_v0 = vld [vmem:[%s3496_s5] sm:$0xf] }
 0x7f8   :  { %v1164_v41 = vmul.f32 %v1159_v35, %v3063_v37  ;;  %v1168_v60 = vpop.permute.xlu1 %1167 }
 0x7f9   :  { %v1170_v12 = vadd.f32 %v1168_v60, %v1161_v7  ;;  %v1171_v31 = vadd.f32 %v1168_v60, %v1162_v17  ;;  %v1172_v27 = vadd.f32 %v1168_v60, %v1163_v45 }
 0x7fa   :  { %v1173_v20 = vadd.f32 %v1168_v60, %v1164_v41 }
 0x7fb   :  { %v1174_v5 = vmax.f32 %v1170_v12, 0.0  ;;  %v1175_v8 = vmax.f32 %v1171_v31, 0.0  ;;  %v1176_v63 = vmax.f32 %v1172_v27, 0.0  ;;  %1426 = vrot.lane.b32.xlu0 %v3105_v58, %s2396_s10  ;;  %1422 = vrot.lane.b32.xlu1 %v3139_v61, %s2396_s10 }
 0x7fc   :  { %v1177_v30 = vmax.f32 %v1173_v20, 0.0  ;;  %v1181_v14 = vpop.permute.xlu1 %1180 }
 0x7fd   :  { %2319 = vmatprep.subr.msk.mxu0 %vm354_vm0, %v1175_v8 }
 0x7fe   :  { %2322 = vmatprep.subr.msk.mxu1 %vm354_vm0, %v1177_v30  ;;  %2320 = vmatpush1.msk.msra.mxu0 %vm354_vm0, %v1174_v5 }
 0x7ff   :  { %2323 = vmatpush1.msk.msra.mxu1 %vm354_vm0, %v1176_v63  ;;  %1434 = vrot.lane.b32.xlu0 %v3142_v42, %s2396_s10 }
 0x800   :  { %1430 = vrot.lane.b32.xlu1 %v3108_v38, %s2396_s10  ;;  %2321 = vmatmul.mubr.msk.f32.vlgmr.msra.gmra.mxu0 %vm1182_vm7, %v1181_v14 }
 0x801   :  { %2324 = vmatmul.mubr.msk.f32.vlgmr.msra.gmra.mxu1 %vm1182_vm7, %v1181_v14  ;;  %1605 = vmatprep.mubr.f32.mxu0 %v2395_v55 }
 0x802   :  { %1676 = vmatprep.mubr.f32.mxu1 %v2395_v55 }
 0x803   :  { %1523 = vperm.xlu0 %2367, %v3186_v0  }
 0x807   :  { %2368 = vset.pattern.permute.xlu0 %v2389_v2 }
 0x808   :  { %1721 = vrot.lane.b32.xlu0 %v1346_v24, %s2401_s20 }
 0x849   :  { %v1461_v37 = vpop.permute.xlu1 %1460 }
 0x84d   :  { %v1465_v59 = vpop.permute.xlu0 %1464 }
 0x84e   :  { %v1473_v62 = vsel %vm517_vm4, %v1461_v37, %v1465_v59 }
 0x84f   :  { %v1483_v39 = vmul.f32 %v1473_v62, %v2557_v19 }
 0x851   :  { %2326 = vmatprep.subr.msk.mxu0 %vm354_vm0, %v1483_v39 }
 0x859   :  { %v1469_v3 = vpop.permute.xlu0 %1468  ;;  %v1457_v35 = vpop.permute.xlu1 %1456 }
 0x85a   :  { %v1471_v7 = vsel %vm517_vm4, %v1465_v59, %v1469_v3  ;;  %v1475_v17 = vsel %vm517_vm4, %v1457_v35, %v1461_v37  ;;  %v1477_v45 = vsel %vm517_vm4, %v1469_v3, %v1457_v35 }
 0x85b   :  { %v1484_v41 = vmul.f32 %v1471_v7, %v2577_v29  ;;  %v1482_v60 = vmul.f32 %v1475_v17, %v2566_v23  ;;  %v1485_v12 = vmul.f32 %v1477_v45, %v2569_v25 }
 0x85d   :  { %v1429_v31 = vpop.permute.xlu0 %1428  ;;  %2327 = vmatpush1.msk.msra.mxu0 %vm354_vm0, %v1482_v60  ;;  %2329 = vmatprep.subr.msk.mxu1 %vm354_vm0, %v1485_v12  ;;  %v1425_v27 = vpop.permute.xlu1 %1424 }
 0x85e   :  { %2330 = vmatpush1.msk.msra.mxu1 %vm354_vm0, %v1484_v41  ;;  %v1443_v8 = vsel %vm484_vm5, %v1425_v27, %v1429_v31 }
 0x85f   :  { %v1451_v3 = vmul.f32 %v1443_v8, %v2554_v16 }
 0x861   :  { %v1459_v20 = vpop.permute.xlu0 %1458  ;;  %v1437_v5 = vpop.permute.xlu1 %1436 }
 0x862   :  { %v1445_v14 = vsel %vm484_vm5, %v1437_v5, %v1425_v27 }
 0x863   :  { %v1450_v35 = vmul.f32 %v1445_v14, %v2560_v21 }
 0x865   :  { %v1455_v63 = vpop.permute.xlu0 %1454  ;;  %v1463_v30 = vpop.permute.xlu1 %1462  ;;  %v1514_v14 = vsel %vm354_vm0, %v1450_v35, %v1494_v1 }
 0x866   :  { %v1474_v37 = vsel %vm517_vm4, %v1455_v63, %v1459_v20  ;;  %v1472_v59 = vsel %vm517_vm4, %v1459_v20, %v1463_v30 }
 0x867   :  { %v1478_v62 = vmul.f32 %v1474_v37, %v2566_v23  ;;  %v1479_v39 = vmul.f32 %v1472_v59, %v2557_v19 }
 0x869   :  { %v1467_v7 = vpop.permute.xlu0 %1466  ;;  %1565 = vmatprep.subr.mxu0 %v1479_v39  ;;  %v1433_v17 = vpop.permute.xlu1 %1432 }
 0x86a   :  { %v1470_v45 = vsel %vm517_vm4, %v1463_v30, %v1467_v7  ;;  %v1476_v41 = vsel %vm517_vm4, %v1467_v7, %v1455_v63  ;;  %v1439_v60 = vsel %vm484_vm5, %v1433_v17, %v1437_v5  ;;  %v1441_v12 = vsel %vm484_vm5, %v1429_v31, %v1433_v17  ;;  %1566 = vmatpush1.msra.mxu0 %v1478_v62 }
 0x86b   :  { %v1480_v27 = vmul.f32 %v1470_v45, %v2577_v29  ;;  %v1481_v20 = vmul.f32 %v1476_v41, %v2569_v25  ;;  %1567 = vmatprep.subr.mxu0 %v3121_v49  ;;  %v1453_v8 = vmul.f32 %v1439_v60, %v2563_v22  ;;  %v1515_v63 = vsel %vm354_vm0, %v1451_v3, %v1495_v44 }
 0x86c   :  { %1568 = vmatpush1.msra.mxu0 %v3149_v6  ;;  %v1452_v5 = vmul.f32 %v1441_v12, %v2575_v28 }
 0x86d   :  { %v1427_v30 = vpop.permute.xlu0 %1426  ;;  %1569 = vmatprep.subr.mxu0 %v1515_v63  ;;  %1636 = vmatprep.subr.mxu1 %v1481_v20  ;;  %v1423_v31 = vpop.permute.xlu1 %1422  ;;  %v1517_v58 = vsel %vm354_vm0, %v1453_v8, %v1497_v15  ;;  %v2325_v15 = vld [vmem:[%s3497_s4 + $0x8] sm:$0xf] }
 0x86e   :  { %v1442_v49 = vsel %vm484_vm5, %v1423_v31, %v1427_v30  ;;  %1570 = vmatpush1.msra.mxu0 %v1514_v14  ;;  %1637 = vmatpush1.msra.mxu1 %v1480_v27  ;;  %v1516_v61 = vsel %vm354_vm0, %v1452_v5, %v1496_v43 }
 0x86f   :  { %v1447_v6 = vmul.f32 %v1442_v49, %v2554_v16  ;;  %1638 = vmatprep.subr.mxu1 %v3154_v33 }
 0x870   :  { %1639 = vmatpush1.msra.mxu1 %v3126_v34 }
 0x871   :  { %v1435_v44 = vpop.permute.xlu0 %1434  ;;  %1571 = vmatprep.subr.mxu0 %v1447_v6  ;;  %1640 = vmatprep.subr.mxu1 %v1517_v58 }
 0x872   :  { %v1444_v1 = vsel %vm484_vm5, %v1435_v44, %v1423_v31  ;;  %v1431_v37 = vpop.permute.xlu1 %1430  ;;  %1641 = vmatpush1.msra.mxu1 %v1516_v61 }
 0x873   :  { %v1446_v33 = vmul.f32 %v1444_v1, %v2560_v21  ;;  %v1438_v34 = vsel %vm484_vm5, %v1431_v37, %v1435_v44  ;;  %v1440_v42 = vsel %vm484_vm5, %v1427_v30, %v1431_v37 }
 0x874   :  { %v1448_v38 = vmul.f32 %v1440_v42, %v2575_v28  ;;  %v1449_v43 = vmul.f32 %v1438_v34, %v2563_v22 }
 0x875   :  { %1572 = vmatpush1.msra.mxu0 %v1446_v33  ;;  %v2402_v33 = vmov 3  }
 0x876   :  { %1642 = vmatprep.subr.mxu1 %v1449_v43  ;;  %2328 = vmatmul.mubr.msk.f32.vlgmr.msra.gmra.mxu0 %vm573_vm6, %v2325_v15 }
 0x877   :  { %1643 = vmatpush1.msra.mxu1 %v1448_v38  ;;  %1976 = vmatprep.mubr.f32.mxu0 %v2395_v55 }
 0x878   :  { %2331 = vmatmul.mubr.msk.f32.vlgmr.msra.gmra.mxu1 %vm573_vm6, %v2325_v15  ;;  %2370 = vset.pattern.permute.xlu1 %v2402_v33 }
 0x879   :  { %2047 = vmatprep.mubr.f32.mxu1 %v2395_v55 }
 0x87e   :  { %v1524_v3 = vpop.permute.xlu0 %1523 }
 0x8c0   :  { %v3270_v59 = vpop.f32.mrf.mxu0 }
 0x8c1   :  { %v3272_v62 = vpop.f32.mrf.mxu1 }
 0x8c2   :  { %v3274_v39 = vpop.f32.mrf.mxu0 }
 0x8c3   :  { %v3276_v35 = vpop.f32.mrf.mxu1 }
 0x936   :  { %v1607_v7 = vpop.f32.mrf.mxu0 }
 0x937   :  { %v1608_v17 = vadd.f32 %v1607_v7, %v1524_v3 }
 0x938   :  { %v1678_v45 = vpop.f32.mrf.mxu1  ;;  %v1609_v41 = vpop.f32.mrf.mxu0 }
 0x939   :  { %v1683_v60 = vmul.f32 %v1608_v17, %v1608_v17  ;;  %v1679_v12 = vadd.f32 %v1678_v45, %v1524_v3  ;;  %v1610_v27 = vadd.f32 %v1609_v41, %v1524_v3  ;;  %v1722_v45 = vpop.permute.xlu0 %1721 }
 0x93a   :  { %v1680_v20 = vpop.f32.mrf.mxu1 }
 0x93b   :  { %v1691_v8 = vrot.slane %v1683_v60, 4  ;;  %v1685_v18 = vmul.f32 %v1679_v12, %v1679_v12  ;;  %v1684_v24 = vmul.f32 %v1610_v27, %v1610_v27  ;;  %v1681_v63 = vadd.f32 %v1680_v20, %v1524_v3 }
 0x93d   :  { %v1693_v5 = vrot.slane %v1685_v18, 4  ;;  %v1692_v30 = vrot.slane %v1684_v24, 4  ;;  %v1686_v31 = vmul.f32 %v1681_v63, %v1681_v63  ;;  %v1699_v14 = vsel %vm354_vm0, %v1608_v17, %v1691_v8 }
 0x93f   :  { %v1700_v49 = vsel %vm354_vm0, %v1610_v27, %v1692_v30  ;;  %v1694_v6 = vrot.slane %v1686_v31, 4  ;;  %v1701_v44 = vsel %vm354_vm0, %v1679_v12, %v1693_v5 }
 0x940   :  { %v1703_v58 = vadd.f32 %v1700_v49, %v1699_v14 }
 0x941   :  { %v1702_v1 = vsel %vm354_vm0, %v1681_v63, %v1694_v6 }
 0x942   :  { %v1704_v61 = vadd.f32 %v1703_v58, %v1701_v44 }
 0x944   :  { %v1705_v37 = vadd.f32 %v1704_v61, %v1702_v1 }
 0x946   :  { %1706 = vadd.xlane.f32.xlu1 %v1705_v37 }
 0x9cf   :  { %v1707_v34 = vpop.xlane.xlu1 %1706 }
 0x9d0   :  { %v1708_v42 = vmul.f32 0.001953125, %v1707_v34 }
 0x9d2   :  { %v1709_v15 = vmul.f32 %v1708_v42, %v1708_v42  ;;  %v1716_v18 = vsub.f32 %v1610_v27, %v1708_v42  ;;  %v1715_v24 = vsub.f32 %v1608_v17, %v1708_v42  ;;  %v1717_v5 = vsub.f32 %v1679_v12, %v1708_v42 }
 0x9d3   :  { %v1718_v6 = vsub.f32 %v1681_v63, %v1708_v42 }
 0x9d4   :  { %v1711_v38 = vrot.slane %v1709_v15, 4 }
 0x9d6   :  { %v1713_v43 = vsub.f32 %v1708_v42, %v1711_v38 }
 0x9d8   :  { %v1714_v3 = vmax.f32 %v1713_v43, 0.0 }
 0x9da   :  { %v1719_v7 = vadd.f32 1e-05, %v1714_v3 }
 0x9dc   :  { %2383 = vrsqrt.f32 %v1719_v7 }
 0x9e9   :  { %v2384_v41 = vpop.eup %2383 }
 0x9ea   :  { %v1724_v60 = vmul.f32 %v2384_v41, %v1722_v45 }
 0x9ec   :  { %1727 = vperm.xlu0 %2368, %v1724_v60  }
 0x9f0   :  { %2369 = vset.pattern.permute.xlu0 %v2402_v33 }
 0x9f1   :  { %1736 = vperm.xlu0 %2369, %v3050_v47  }
 0x9f5   :  { %2372 = vset.pattern.permute.xlu0 %v2389_v2 }
 0xa67   :  { %v1728_v20 = vpop.permute.xlu0 %1727 }
 0xa68   :  { %v1729_v8 = vrot.slane %v1728_v20, 4 }
 0xa6a   :  { %v1732_v30 = vmul.f32 %v1729_v8, %v1716_v18  ;;  %v1731_v31 = vmul.f32 %v1729_v8, %v1715_v24  ;;  %v1733_v14 = vmul.f32 %v1729_v8, %v1717_v5  ;;  %v1734_v61 = vmul.f32 %v1729_v8, %v1718_v6 }
 0xa6c   :  { %v1737_v49 = vpop.permute.xlu0 %1736 }
 0xa6d   :  { %v1740_v58 = vadd.f32 %v1737_v49, %v1732_v30  ;;  %v1739_v44 = vadd.f32 %v1737_v49, %v1731_v31  ;;  %v1741_v1 = vadd.f32 %v1737_v49, %v1733_v14  ;;  %v1742_v47 = vadd.f32 %v1737_v49, %v1734_v61 }
 0xa6f   :  { %v1744_v37 = vmax.f32 %v1740_v58, 0.0  ;;  %v1743_v33 = vmax.f32 %v1739_v44, 0.0  ;;  %v1745_v34 = vmax.f32 %v1741_v1, 0.0  ;;  %v1746_v17 = vmax.f32 %v1742_v47, 0.0 }
 0xa71   :  { %1765 = vrot.lane.b32.xlu0 %v1744_v37, %s2393_s18  ;;  %1747 = vrot.lane.b32.xlu1 %v1743_v33, %s2392_s17  ;;  %v1784_v60 = vrot.slane %v1744_v37, 4  ;;  %v1785_v5 = vrot.slane %v1745_v34, 4 }
 0xa75   :  { %1767 = vrot.lane.b32.xlu0 %v1745_v34, %s2393_s18 }
 0xa79   :  { %1769 = vrot.lane.b32.xlu0 %v1746_v17, %s2393_s18 }
 0xa7d   :  { %1749 = vrot.lane.b32.xlu0 %v1744_v37, %s2392_s17 }
 0xa81   :  { %1751 = vrot.lane.b32.xlu0 %v1745_v34, %s2392_s17 }
 0xa85   :  { %1763 = vrot.lane.b32.xlu0 %v1743_v33, %s2393_s18 }
 0xa89   :  { %1753 = vrot.lane.b32.xlu0 %v1746_v17, %s2392_s17 }
 0xae3   :  { %v1766_v12 = vpop.permute.xlu0 %1765  ;;  %v1748_v3 = vpop.permute.xlu1 %1747 }
 0xae7   :  { %v1768_v27 = vpop.permute.xlu0 %1767 }
 0xae8   :  { %v1772_v63 = vsel %vm451_vm1, %v1766_v12, %v1768_v27 }
 0xae9   :  { %v1776_v42 = vmul.f32 %v1772_v63, %v2609_v40 }
 0xaeb   :  { %v1770_v15 = vpop.permute.xlu0 %1769  ;;  %1833 = vrot.lane.b32.xlu1 %v1776_v42, %s2394_s27 }
 0xaec   :  { %v1771_v38 = vsel %vm451_vm1, %v1768_v27, %v1770_v15  ;;  %v1786_v27 = vrot.slane %v1746_v17, 4 }
 0xaed   :  { %v1777_v43 = vmul.f32 %v1771_v38, %v2618_v46  ;;  %v1873_v46 = vrot.slane %v1776_v42, 4 }
 0xaef   :  { %v1750_v7 = vpop.permute.xlu0 %1749  ;;  %1837 = vrot.lane.b32.xlu0 %v1777_v43, %s2394_s27  ;;  %v1875_v14 = vrot.slane %v1777_v43, 4 }
 0xaf0   :  { %v1757_v45 = vsel %vm434_vm2, %v1748_v3, %v1750_v7 }
 0xaf1   :  { %v1760_v41 = vmul.f32 %v1757_v45, %v2636_v56 }
 0xaf3   :  { %v1752_v20 = vpop.permute.xlu0 %1751  ;;  %v3304_v40 = vsel %vm354_vm0, %v1760_v41, %v1784_v60 }
 0xaf4   :  { %v1756_v8 = vsel %vm434_vm2, %v1750_v7, %v1752_v20  ;;  %v1868_v18 = vrot.slane %v3304_v40, 4 }
 0xaf5   :  { %v1761_v24 = vmul.f32 %v1756_v8, %v2638_v57 }
 0xaf6   :  { %v3313_v30 = vsel %vm354_vm0, %v1868_v18, %v1873_v46 }
 0xaf7   :  { %v1764_v56 = vpop.permute.xlu0 %1763  ;;  %v3316_v31 = vsel %vm354_vm0, %v1761_v24, %v1785_v5 }
 0xaf8   :  { %v1773_v49 = vsel %vm451_vm1, %v1764_v56, %v1766_v12  ;;  %v1869_v6 = vrot.slane %v3316_v31, 4  ;;  %v1774_v58 = vsel %vm451_vm1, %v1770_v15, %v1764_v56  ;;  %v1783_v12 = vrot.slane %v1743_v33, 4 }
 0xaf9   :  { %v1775_v57 = vmul.f32 %v1773_v49, %v2655_v10  ;;  %v1778_v1 = vmul.f32 %v1774_v58, %v2658_v11 }
 0xafa   :  { %v3327_v44 = vsel %vm354_vm0, %v1869_v6, %v1875_v14 }
 0xafb   :  { %1797 = vrot.lane.b32.xlu0 %v1775_v57, %s2396_s10  ;;  %v1754_v61 = vpop.permute.xlu0 %1753  ;;  %1829 = vrot.lane.b32.xlu1 %v1775_v57, %s2394_s27  ;;  %v1871_v15 = vrot.slane %v1775_v57, 4 }
 0xafc   :  { %v1755_v37 = vsel %vm434_vm2, %v1752_v20, %v1754_v61  ;;  %v1758_v47 = vsel %vm434_vm2, %v1754_v61, %v1748_v3 }
 0xafd   :  { %v1759_v10 = vmul.f32 %v1758_v47, %v2621_v48  ;;  %v1762_v34 = vmul.f32 %v1755_v37, %v2625_v50  ;;  %v1877_v48 = vrot.slane %v1778_v1, 4 }
 0xaff   :  { %1809 = vrot.lane.b32.xlu0 %v1778_v1, %s2396_s10  ;;  %1841 = vrot.lane.b32.xlu1 %v1778_v1, %s2394_s27  ;;  %v3341_v63 = vsel %vm354_vm0, %v1759_v10, %v1783_v12  ;;  %v3344_v11 = vsel %vm354_vm0, %v1762_v34, %v1786_v27 }
 0xb00   :  { %v1867_v38 = vrot.slane %v3341_v63, 4  ;;  %v1870_v3 = vrot.slane %v3344_v11, 4 }
 0xb02   :  { %v1872_v50 = vsel %vm354_vm0, %v1867_v38, %v1871_v15  ;;  %v3354_v33 = vsel %vm354_vm0, %v1870_v3, %v1877_v48 }
 0xb03   :  { %1801 = vrot.lane.b32.xlu1 %v1776_v42, %s2396_s10  ;;  %1831 = vrot.lane.b32.xlu0 %v3304_v40, %s2394_s27 }
 0xb07   :  { %1835 = vrot.lane.b32.xlu1 %v3316_v31, %s2394_s27  ;;  %1827 = vrot.lane.b32.xlu0 %v3341_v63, %s2394_s27 }
 0xb0b   :  { %1839 = vrot.lane.b32.xlu1 %v3344_v11, %s2394_s27  ;;  %1805 = vrot.lane.b32.xlu0 %v1777_v43, %s2396_s10 }
 0xb0f   :  { %1799 = vrot.lane.b32.xlu1 %v3304_v40, %s2396_s10  ;;  %1795 = vrot.lane.b32.xlu0 %v3341_v63, %s2396_s10 }
 0xb13   :  { %1807 = vrot.lane.b32.xlu1 %v3344_v11, %s2396_s10  ;;  %1803 = vrot.lane.b32.xlu0 %v3316_v31, %s2396_s10  ;;  %v2332_v31 = vld [vmem:[%s3497_s4 + $0xc] sm:$0xf] }
 0xb17   :  { %1894 = vperm.xlu1 %2370, %v3186_v0  }
 0xb1b   :  { %2371 = vset.pattern.permute.xlu1 %v2389_v2 }
 0xb5d   :  { %v1834_v17 = vpop.permute.xlu1 %1833 }
 0xb61   :  { %v1838_v42 = vpop.permute.xlu0 %1837 }
 0xb62   :  { %v1846_v43 = vsel %vm517_vm4, %v1834_v17, %v1838_v42 }
 0xb63   :  { %v1856_v7 = vmul.f32 %v1846_v43, %v2557_v19 }
 0xb65   :  { %2333 = vmatprep.subr.msk.mxu0 %vm354_vm0, %v1856_v7 }
 0xb6d   :  { %v1798_v45 = vpop.permute.xlu0 %1797  ;;  %v1830_v41 = vpop.permute.xlu1 %1829 }
 0xb6e   :  { %v1848_v60 = vsel %vm517_vm4, %v1830_v41, %v1834_v17 }
 0xb6f   :  { %v1855_v20 = vmul.f32 %v1848_v60, %v2566_v23 }
 0xb71   :  { %v1810_v8 = vpop.permute.xlu0 %1809  ;;  %2334 = vmatpush1.msk.msra.mxu0 %vm354_vm0, %v1855_v20  ;;  %v1842_v2 = vpop.permute.xlu1 %1841 }
 0xb72   :  { %v1844_v0 = vsel %vm517_vm4, %v1838_v42, %v1842_v2  ;;  %v1850_v46 = vsel %vm517_vm4, %v1842_v2, %v1830_v41  ;;  %v1818_v61 = vsel %vm484_vm5, %v1810_v8, %v1798_v45 }
 0xb73   :  { %v1857_v24 = vmul.f32 %v1844_v0, %v2577_v29  ;;  %v1858_v5 = vmul.f32 %v1850_v46, %v2569_v25  ;;  %v1823_v12 = vmul.f32 %v1818_v61, %v2560_v21 }
 0xb75   :  { %v1832_v56 = vpop.permute.xlu0 %1831  ;;  %2336 = vmatprep.subr.msk.mxu1 %vm354_vm0, %v1858_v5  ;;  %v1802_v14 = vpop.permute.xlu1 %1801 }
 0xb76   :  { %2337 = vmatpush1.msk.msra.mxu1 %vm354_vm0, %v1857_v24  ;;  %v1816_v49 = vsel %vm484_vm5, %v1798_v45, %v1802_v14 }
 0xb77   :  { %v1824_v34 = vmul.f32 %v1816_v49, %v2554_v16 }
 0xb79   :  { %v1836_v58 = vpop.permute.xlu1 %1835  ;;  %v1828_v57 = vpop.permute.xlu0 %1827  ;;  %v1888_v45 = vsel %vm354_vm0, %v1824_v34, %v1868_v18 }
 0xb7a   :  { %v1845_v1 = vsel %vm517_vm4, %v1832_v56, %v1836_v58  ;;  %v1847_v37 = vsel %vm517_vm4, %v1828_v57, %v1832_v56 }
 0xb7b   :  { %v1852_v47 = vmul.f32 %v1845_v1, %v2557_v19  ;;  %v1851_v10 = vmul.f32 %v1847_v37, %v2566_v23 }
 0xb7d   :  { %1936 = vmatprep.subr.mxu0 %v1852_v47  ;;  %v1840_v27 = vpop.permute.xlu1 %1839  ;;  %v1806_v15 = vpop.permute.xlu0 %1805 }
 0xb7e   :  { %v1843_v48 = vsel %vm517_vm4, %v1836_v58, %v1840_v27  ;;  %v1849_v17 = vsel %vm517_vm4, %v1840_v27, %v1828_v57  ;;  %v1812_v42 = vsel %vm484_vm5, %v1806_v15, %v1810_v8  ;;  %v1814_v19 = vsel %vm484_vm5, %v1802_v14, %v1806_v15  ;;  %1937 = vmatpush1.msra.mxu0 %v1851_v10 }
 0xb7f   :  { %v1853_v23 = vmul.f32 %v1843_v48, %v2577_v29  ;;  %v1854_v43 = vmul.f32 %v1849_v17, %v2569_v25  ;;  %1938 = vmatprep.subr.mxu0 %v3313_v30  ;;  %v1826_v7 = vmul.f32 %v1812_v42, %v2563_v22  ;;  %v1825_v41 = vmul.f32 %v1814_v19, %v2575_v28 }
 0xb80   :  { %1939 = vmatpush1.msra.mxu0 %v1872_v50  ;;  %v1887_v29 = vsel %vm354_vm0, %v1823_v12, %v1867_v38 }
 0xb81   :  { %v1800_v60 = vpop.permute.xlu1 %1799  ;;  %2007 = vmatprep.subr.mxu1 %v1854_v43  ;;  %v1796_v20 = vpop.permute.xlu0 %1795  ;;  %1940 = vmatprep.subr.mxu0 %v1888_v45  ;;  %v1890_v40 = vsel %vm354_vm0, %v1826_v7, %v1870_v3  ;;  %v1889_v38 = vsel %vm354_vm0, %v1825_v41, %v1869_v6  ;;  %v2058_v43 = vld [vmem:[%s3494_s6 + $0xc] sm:$0xf] }
 0xb82   :  { %v1815_v25 = vsel %vm484_vm5, %v1796_v20, %v1800_v60  ;;  %1941 = vmatpush1.msra.mxu0 %v1887_v29  ;;  %2008 = vmatpush1.msra.mxu1 %v1853_v23  ;;  %v2099_v7 = vrot.slane %v2058_v43, 4 }
 0xb83   :  { %v1820_v30 = vmul.f32 %v1815_v25, %v2554_v16  ;;  %2009 = vmatprep.subr.mxu1 %v3354_v33 }
 0xb84   :  { %2010 = vmatpush1.msra.mxu1 %v3327_v44 }
 0xb85   :  { %v1808_v18 = vpop.permute.xlu1 %1807  ;;  %2011 = vmatprep.subr.mxu1 %v1890_v40  ;;  %v1804_v63 = vpop.permute.xlu0 %1803  ;;  %1942 = vmatprep.subr.mxu0 %v1820_v30 }
 0xb86   :  { %v1817_v50 = vsel %vm484_vm5, %v1808_v18, %v1796_v20  ;;  %v1811_v16 = vsel %vm484_vm5, %v1804_v63, %v1808_v18  ;;  %v1813_v44 = vsel %vm484_vm5, %v1800_v60, %v1804_v63  ;;  %2012 = vmatpush1.msra.mxu1 %v1889_v38  ;;  %v2059_v60 = vld [vmem:[%s3493_s7 + $0xc] sm:$0xf]  ;;  %v184_v20 = vld [vmem:[%s3498_s9] sm:$0xf] }
 0xb87   :  { %v1819_v11 = vmul.f32 %v1817_v50, %v2560_v21  ;;  %v1821_v3 = vmul.f32 %v1813_v44, %v2575_v28  ;;  %v1822_v33 = vmul.f32 %v1811_v16, %v2563_v22 }
 0xb89   :  { %1943 = vmatpush1.msra.mxu0 %v1819_v11  ;;  %2013 = vmatprep.subr.mxu1 %v1822_v33 }
 0xb8a   :  { %2335 = vmatmul.mubr.msk.f32.vlgmr.msra.gmra.mxu0 %vm573_vm6, %v2332_v31  ;;  %2014 = vmatpush1.msra.mxu1 %v1821_v3 }
 0xb8b   :  { %2338 = vmatmul.mubr.msk.f32.vlgmr.msra.gmra.mxu1 %vm573_vm6, %v2332_v31  ;;  %2205 = vmatprep.mubr.f32.mxu0 %v2395_v55 }
 0xb8c   :  { %2276 = vmatprep.mubr.f32.mxu1 %v2395_v55 }
 0xb92   :  { %v1895_v21 = vpop.permute.xlu1 %1894 }
 0xc4a   :  { %v1978_v36 = vpop.f32.mrf.mxu0 }
 0xc4b   :  { %v1979_v28 = vadd.f32 %v1978_v36, %v1895_v21  ;;  %v2049_v6 = vpop.f32.mrf.mxu1 }
 0xc4c   :  { %v2050_v22 = vadd.f32 %v2049_v6, %v1895_v21  ;;  %v1980_v8 = vpop.f32.mrf.mxu0 }
 0xc4d   :  { %v2054_v2 = vadd.f32 %v1979_v28, %v3018_v9  ;;  %v1981_v0 = vadd.f32 %v1980_v8, %v1895_v21  ;;  %v2051_v46 = vpop.f32.mrf.mxu1 }
 0xc4e   :  { %v2056_v24 = vadd.f32 %v2050_v22, %v3023_v26  ;;  %v2052_v5 = vadd.f32 %v2051_v46, %v1895_v21 }
 0xc4f   :  { %v2060_v56 = vmul.f32 %v2054_v2, %v2054_v2  ;;  %v2055_v14 = vadd.f32 %v1981_v0, %v3028_v32 }
 0xc50   :  { %v2062_v49 = vmul.f32 %v2056_v24, %v2056_v24  ;;  %v2057_v58 = vadd.f32 %v2052_v5, %v3031_v13 }
 0xc51   :  { %v2068_v55 = vrot.slane %v2060_v56, 4  ;;  %v2061_v57 = vmul.f32 %v2055_v14, %v2055_v14 }
 0xc52   :  { %v2063_v61 = vmul.f32 %v2057_v58, %v2057_v58  ;;  %v2070_v1 = vrot.slane %v2062_v49, 4 }
 0xc53   :  { %v2069_v37 = vrot.slane %v2061_v57, 4  ;;  %v2076_v47 = vsel %vm354_vm0, %v2054_v2, %v2068_v55 }
 0xc54   :  { %v2071_v10 = vrot.slane %v2063_v61, 4  ;;  %v2078_v26 = vsel %vm354_vm0, %v2056_v24, %v2070_v1 }
 0xc55   :  { %v2077_v9 = vsel %vm354_vm0, %v2055_v14, %v2069_v37 }
 0xc56   :  { %v2080_v34 = vadd.f32 %v2077_v9, %v2076_v47  ;;  %v2079_v27 = vsel %vm354_vm0, %v2057_v58, %v2071_v10 }
 0xc58   :  { %v2081_v12 = vadd.f32 %v2080_v34, %v2078_v26 }
 0xc5a   :  { %v2082_v32 = vadd.f32 %v2081_v12, %v2079_v27 }
 0xc5c   :  { %2083 = vadd.xlane.f32.xlu0 %v2082_v32 }
 0xce5   :  { %v2084_v15 = vpop.xlane.xlu0 %2083 }
 0xce6   :  { %v2085_v13 = vmul.f32 0.001953125, %v2084_v15 }
 0xce8   :  { %v2086_v48 = vmul.f32 %v2085_v13, %v2085_v13  ;;  %v2092_v25 = vsub.f32 %v2054_v2, %v2085_v13  ;;  %v2093_v40 = vsub.f32 %v2055_v14, %v2085_v13  ;;  %v2094_v18 = vsub.f32 %v2056_v24, %v2085_v13 }
 0xce9   :  { %v2095_v63 = vsub.f32 %v2057_v58, %v2085_v13 }
 0xcea   :  { %v2088_v17 = vrot.slane %v2086_v48, 4 }
 0xcec   :  { %v2090_v42 = vsub.f32 %v2085_v13, %v2088_v17 }
 0xcee   :  { %v2091_v19 = vmax.f32 %v2090_v42, 0.0 }
 0xcf0   :  { %v2096_v23 = vadd.f32 1e-05, %v2091_v19 }
 0xcf2   :  { %2385 = vrsqrt.f32 %v2096_v23 }
 0xcff   :  { %v2386_v45 = vpop.eup %2385 }
 0xd00   :  { %v2101_v41 = vmul.f32 %v2386_v45, %v2099_v7 }
 0xd02   :  { %2104 = vperm.xlu1 %2371, %v2101_v41  }
 0xd06   :  { %2114 = vperm.xlu1 %2371, %v2059_v60  }
 0xd0a   :  { %2125 = vrot.lane.b32.xlu1 %v3087_v4, %s2403_s22 }
 0xd0e   :  { %187 = vperm.xlu1 %2371, %v184_v20  }
 0xd7d   :  { %v2105_v29 = vpop.permute.xlu1 %2104 }
 0xd7e   :  { %v2106_v30 = vrot.slane %v2105_v29, 4 }
 0xd80   :  { %v2108_v38 = vmul.f32 %v2106_v30, %v2092_v25  ;;  %v2109_v50 = vmul.f32 %v2106_v30, %v2093_v40  ;;  %v2110_v16 = vmul.f32 %v2106_v30, %v2094_v18  ;;  %v2111_v44 = vmul.f32 %v2106_v30, %v2095_v63 }
 0xd81   :  { %v2115_v11 = vpop.permute.xlu1 %2114 }
 0xd82   :  { %v2117_v3 = vadd.f32 %v2115_v11, %v2108_v38  ;;  %v2118_v33 = vadd.f32 %v2115_v11, %v2109_v50  ;;  %v2119_v31 = vadd.f32 %v2115_v11, %v2110_v16  ;;  %v2120_v4 = vadd.f32 %v2115_v11, %v2111_v44 }
 0xd84   :  { %v2121_v21 = vmax.f32 %v2117_v3, 0.0  ;;  %v2122_v36 = vmax.f32 %v2118_v33, 0.0  ;;  %v2123_v28 = vmax.f32 %v2119_v31, 0.0  ;;  %v2124_v6 = vmax.f32 %v2120_v4, 0.0 }
 0xd85   :  { %v2126_v22 = vpop.permute.xlu1 %2125 }
 0xd86   :  { %2339 = vmatprep.subr.msk.mxu0 %vm354_vm0, %v2122_v36  ;;  %2342 = vmatprep.subr.msk.mxu1 %vm354_vm0, %v2124_v6 }
 0xd87   :  { %2340 = vmatpush1.msk.msra.mxu0 %vm354_vm0, %v2121_v21  ;;  %2343 = vmatpush1.msk.msra.mxu1 %vm354_vm0, %v2123_v28 }
 0xd88   :  { %2341 = vmatmul.mubr.msk.f32.vlgmr.msra.gmra.mxu0 %vm1182_vm7, %v2126_v22  ;;  %2344 = vmatmul.mubr.msk.f32.vlgmr.msra.gmra.mxu1 %vm1182_vm7, %v2126_v22 }
 0xd89   :  { %v188_v8 = vpop.permute.xlu1 %187 }
 0xd8a   :  { %v261_v2 = vadd.f32 %v2826_v51, %v188_v8  ;;  %v263_v0 = vadd.f32 %v2830_v53, %v188_v8  ;;  %v332_v46 = vadd.f32 %v2828_v52, %v188_v8  ;;  %v334_v24 = vadd.f32 %v2832_v54, %v188_v8 }
 0xd8c   :  { %v1339_v14 = vadd.f32 %v3270_v59, %v261_v2  ;;  %v1341_v49 = vadd.f32 %v3272_v62, %v332_v46  ;;  %v1340_v58 = vadd.f32 %v3274_v39, %v263_v0  ;;  %v1342_v55 = vadd.f32 %v3276_v35, %v334_v24 }
 0xe48   :  { %v2207_v5 = vpop.f32.mrf.mxu0  ;;  %v2278_v56 = vpop.f32.mrf.mxu1 }
 0xe49   :  { %v2283_v1 = vadd.f32 %v2207_v5, %v1339_v14  ;;  %v2285_v51 = vadd.f32 %v2278_v56, %v1341_v49 }
 0xe4a   :  { %v2209_v57 = vpop.f32.mrf.mxu0  ;;  %v2280_v61 = vpop.f32.mrf.mxu1 }
 0xe4b   :  { %v2284_v37 = vadd.f32 %v2209_v57, %v1340_v58  ;;  %v2286_v53 = vadd.f32 %v2280_v61, %v1342_v55 }
 0xe4d   :  { %v2291_v47 = vcombine.low %v2283_v1, %v2284_v37  ;;  %v2292_v52 = vcombine.low %v2285_v51, %v2286_v53 }
 0xe4f   :  { %2295 = vst [vmem:[%s3499_s11] sm:$0xff] %v2291_v47  ;;  %2296 = vst [vmem:[%s3499_s11 + $0x8] sm:$0xff] %v2292_v52 }

</bundles_post_ra>
